<compile_context>
chip_gen: v6e
topology: v6e:2x2x1
jax: 0.10.0
libtpu: 0.0.40
codegen_flags: <defaults>
</compile_context>

<pallas_src>
import math

import jax
import jax.numpy as jnp
from jax.experimental import pallas as pl
from jax.experimental.pallas import tpu as pltpu

LANE = 128


def _round_up(n, m):
    return ((n + m - 1) // m) * m


# ----------------------------------------------------------------------------
# Layer structure (mirrors the PyTorch __init__ exactly)
# ----------------------------------------------------------------------------
def layer_dims(input_dim, hidden_dims, encoding_dim):
    """Returns list of (in_dim, out_dim, has_bn_relu) for encoder + decoder."""
    layers = []
    in_dim = input_dim
    for i, out_dim in enumerate(hidden_dims):
        out_dim = int(in_dim / 2) if i > 0 else out_dim
        layers.append((in_dim, out_dim, True))      # Linear + BN + ReLU (+Dropout)
        in_dim = out_dim
    layers.append((in_dim, encoding_dim, False))    # Linear -> encoding (no act)
    in_dim = encoding_dim
    for i, out_dim in enumerate(reversed(hidden_dims)):
        out_dim = int(in_dim / 2) if i > 0 else out_dim
        layers.append((in_dim, out_dim, True))      # Linear + BN + ReLU (+Dropout)
        in_dim = out_dim
    layers.append((in_dim, input_dim, False))       # Linear -> input_dim, Sigmoid
    return layers


# ----------------------------------------------------------------------------
# Pallas kernel: whole MLP fused per batch tile
# ----------------------------------------------------------------------------
def make_dae_kernel(relu_flags, add_noise):
    n_layers = len(relu_flags)

    def kernel(*refs):
        # refs = (x, [noise], W0, b0, W1, b1, ..., out)
        out_ref = refs[-1]
        if add_noise:
            x_ref, noise_ref = refs[0], refs[1]
            param_refs = refs[2:-1]
            h = x_ref[...] + 0.1 * noise_ref[...]            # f32 [TB, D]
        else:
            x_ref = refs[0]
            param_refs = refs[1:-1]
            h = x_ref[...]                                   # f32 [TB, D]
        for l in range(n_layers):
            w = param_refs[2 * l][...]        # [in_pad, out_pad] bf16 (BN folded)
            b = param_refs[2 * l + 1][...]    # [1, out_pad]      f32  (BN folded)
            h = jnp.dot(h.astype(w.dtype), w,
                        preferred_element_type=jnp.float32) + b
            if relu_flags[l]:
                h = jnp.maximum(h, 0.0)
        out_ref[...] = jax.nn.sigmoid(h).astype(out_ref.dtype)

    return kernel


def _default_num_tiles():
    """1 tile on single-TC chips (v5e/v6e), 2 balanced tiles on v7x (2 TCs)."""
    try:
        kind = jax.devices()[0].device_kind.lower()
        if "v7" in kind:
            return 2
    except Exception:
        pass
    return 1


def dae_forward(x, Ws, Bs, relu_flags, *, noise=None, num_tiles=None,
                max_rows_per_tile=256):
    """x: [B, D] f32. Ws: list of [in_pad, out_pad] bf16. Bs: [1, out_pad] f32.

    Returns the reconstruction [B, D] (lane padding sliced off).
    """
    B, D = x.shape
    out_pad = Ws[-1].shape[1]                  # padded output width (128k)
    add_noise = noise is not None

    if num_tiles is None:
        num_tiles = _default_num_tiles()
    # Cap per-tile rows so the unrolled f32 activation chain doesn't spill vregs.
    num_tiles = max(num_tiles, pl.cdiv(B, max_rows_per_tile))
    TB = pl.cdiv(B, num_tiles)
    TB = max(8, _round_up(TB, 8))              # f32 sublane multiple
    grid = (pl.cdiv(B, TB),)
    # NOTE: if B % TB != 0 the last tile computes on padded rows; output writes
    # are masked so the result is still correct.

    in_specs = [pl.BlockSpec((TB, D), lambda i: (i, 0))]            # x (batch tiled)
    operands = [x]
    if add_noise:
        in_specs.append(pl.BlockSpec((TB, D), lambda i: (i, 0)))    # noise (tiled)
        operands.append(noise)
    for W, b in zip(Ws, Bs):
        in_specs.append(pl.BlockSpec(W.shape, lambda i: (0, 0)))    # grid-invariant
        in_specs.append(pl.BlockSpec(b.shape, lambda i: (0, 0)))
        operands.extend([W, b])
    out_specs = pl.BlockSpec((TB, out_pad), lambda i: (i, 0))       # lane-dense store

    out = pl.pallas_call(
        make_dae_kernel(relu_flags, add_noise),
        out_shape=jax.ShapeDtypeStruct((B, out_pad), jnp.float32),
        grid_spec=pltpu.PrefetchScalarGridSpec(
            num_scalar_prefetch=0,
            grid=grid,
            in_specs=in_specs,
            out_specs=out_specs,
        ),
        compiler_params=pltpu.CompilerParams(
            dimension_semantics=("parallel",)),
    )(*operands)
    return out[:, :D]


# ----------------------------------------------------------------------------
# Parameter init (PyTorch-Linear-style uniform) + eval-mode BN folding
# + zero-padding of every layer's output dim to 128 lanes
# ----------------------------------------------------------------------------
def init_params(key, layers, *, bn_eps=1e-5, weight_dtype=jnp.bfloat16):
    Ws, Bs = [], []
    prev_out_pad = None
    for idx, (fan_in, fan_out, has_bn) in enumerate(layers):
        key, kw, kb = jax.random.split(key, 3)
        bound = 1.0 / math.sqrt(fan_in)
        W = jax.random.uniform(kw, (fan_in, fan_out), jnp.float32, -bound, bound)
        b = jax.random.uniform(kb, (1, fan_out), jnp.float32, -bound, bound)
        if has_bn:
            # fresh BatchNorm1d (eval): gamma=1, beta=0, running_mean=0, running_var=1
            gamma = jnp.ones((fan_out,), jnp.float32)
            beta = jnp.zeros((fan_out,), jnp.float32)
            mean = jnp.zeros((fan_out,), jnp.float32)
            var = jnp.ones((fan_out,), jnp.float32)
            s = gamma / jnp.sqrt(var + bn_eps)           # per-feature scale
            t = beta - mean * s                          # per-feature shift
            W = W * s[None, :]                           # fold BN into Linear
            b = b * s[None, :] + t[None, :]
        # Zero-pad: rows to the previous layer's padded width, cols to 128k.
        in_pad = fan_in if idx == 0 else prev_out_pad
        out_pad = _round_up(fan_out, LANE)
        Wp = jnp.zeros((in_pad, out_pad), jnp.float32).at[:fan_in, :fan_out].set(W)
        bp = jnp.zeros((1, out_pad), jnp.float32).at[:, :fan_out].set(b)
        Ws.append(Wp.astype(weight_dtype))               # bf16 for the MXU
        Bs.append(bp)                                    # keep f32
        prev_out_pad = out_pad
    return Ws, Bs


# ----------------------------------------------------------------------------
# Pure-JAX reference (same padded params / same bf16 matmul casting)
# ----------------------------------------------------------------------------
def dae_reference(x, Ws, Bs, relu_flags, noise=None):
    h = x if noise is None else x + 0.1 * noise
    for W, b, has_relu in zip(Ws, Bs, relu_flags):
        h = jnp.dot(h.astype(W.dtype), W, preferred_element_type=jnp.float32) + b
        if has_relu:
            h = jnp.maximum(h, 0.0)
    out = jax.nn.sigmoid(h)
    return out[:, :x.shape[1]]


if __name__ == "__main__":
    # Small config consistent with the module:
    #   input_dim=32, hidden_dims=[64, 32], encoding_dim=16, batch=256
    input_dim, hidden_dims, encoding_dim = 32, [64, 32], 16
    B = 256

    layers = layer_dims(input_dim, hidden_dims, encoding_dim)
    relu_flags = tuple(has_bn for (_, _, has_bn) in layers)

    key = jax.random.PRNGKey(0)
    kx, kp, kn = jax.random.split(key, 3)
    x = jax.random.uniform(kx, (B, input_dim), jnp.float32)     # tabular input
    noise = jax.random.normal(kn, (B, input_dim), jnp.float32)  # denoising noise
    Ws, Bs = init_params(kp, layers)

    # 1) Deterministic path (add_noise=False): exact check vs pure-JAX reference.
    out_det = dae_forward(x, Ws, Bs, relu_flags, noise=None)
    out_det = jax.block_until_ready(out_det)
    ref_det = dae_reference(x, Ws, Bs, relu_flags, noise=None)
    assert out_det.shape == (B, input_dim)
    assert jnp.allclose(out_det, ref_det, atol=2e-3, rtol=2e-3), \
        "mismatch vs JAX reference (no-noise path)"

    # 2) Denoising path (add_noise=True): identical noise stream as reference.
    out_noisy = dae_forward(x, Ws, Bs, relu_flags, noise=noise)
    out_noisy = jax.block_until_ready(out_noisy)
    ref_noisy = dae_reference(x, Ws, Bs, relu_flags, noise=noise)
    assert out_noisy.shape == (B, input_dim)
    assert bool(jnp.all(jnp.isfinite(out_noisy)))
    assert jnp.allclose(out_noisy, ref_noisy, atol=2e-3, rtol=2e-3), \
        "mismatch vs JAX reference (noisy path)"

    print("KERNEL_OK")
</pallas_src>

<mosaic_0001>
module attributes {stable_mosaic.version = 11 : i64} {
  func.func @kernel(%arg0: i32, %arg1: memref<256x32xf32, #tpu.memory_space<vmem>>, %arg2: memref<32x128xbf16, #tpu.memory_space<vmem>>, %arg3: memref<1x128xf32, #tpu.memory_space<vmem>>, %arg4: memref<128x128xbf16, #tpu.memory_space<vmem>>, %arg5: memref<1x128xf32, #tpu.memory_space<vmem>>, %arg6: memref<128x128xbf16, #tpu.memory_space<vmem>>, %arg7: memref<1x128xf32, #tpu.memory_space<vmem>>, %arg8: memref<128x128xbf16, #tpu.memory_space<vmem>>, %arg9: memref<1x128xf32, #tpu.memory_space<vmem>>, %arg10: memref<128x128xbf16, #tpu.memory_space<vmem>>, %arg11: memref<1x128xf32, #tpu.memory_space<vmem>>, %arg12: memref<128x128xbf16, #tpu.memory_space<vmem>>, %arg13: memref<1x128xf32, #tpu.memory_space<vmem>>, %arg14: memref<256x128xf32, #tpu.memory_space<vmem>>) attributes {dimension_semantics = [#tpu.dimension_semantics<parallel>], iteration_bounds = array<i64: 1>, scalar_prefetch = 0 : i64, scratch_operands = 0 : i64, tpu.core_type = #tpu.core_type<tc>, window_params = [{transform_indices = @transform_0, window_bounds = array<i64: 256, 32>}, {pipeline_mode = #tpu.pipeline_mode<synchronous>, transform_indices = @transform_1, window_bounds = array<i64: 32, 128>}, {pipeline_mode = #tpu.pipeline_mode<synchronous>, transform_indices = @transform_2, window_bounds = array<i64: 1, 128>}, {pipeline_mode = #tpu.pipeline_mode<synchronous>, transform_indices = @transform_3, window_bounds = array<i64: 128, 128>}, {pipeline_mode = #tpu.pipeline_mode<synchronous>, transform_indices = @transform_4, window_bounds = array<i64: 1, 128>}, {pipeline_mode = #tpu.pipeline_mode<synchronous>, transform_indices = @transform_5, window_bounds = array<i64: 128, 128>}, {pipeline_mode = #tpu.pipeline_mode<synchronous>, transform_indices = @transform_6, window_bounds = array<i64: 1, 128>}, {pipeline_mode = #tpu.pipeline_mode<synchronous>, transform_indices = @transform_7, window_bounds = array<i64: 128, 128>}, {pipeline_mode = #tpu.pipeline_mode<synchronous>, transform_indices = @transform_8, window_bounds = array<i64: 1, 128>}, {pipeline_mode = #tpu.pipeline_mode<synchronous>, transform_indices = @transform_9, window_bounds = array<i64: 128, 128>}, {pipeline_mode = #tpu.pipeline_mode<synchronous>, transform_indices = @transform_10, window_bounds = array<i64: 1, 128>}, {pipeline_mode = #tpu.pipeline_mode<synchronous>, transform_indices = @transform_11, window_bounds = array<i64: 128, 128>}, {pipeline_mode = #tpu.pipeline_mode<synchronous>, transform_indices = @transform_12, window_bounds = array<i64: 1, 128>}, {transform_indices = @transform_13, window_bounds = array<i64: 256, 128>}]} {
    %c0 = arith.constant 0 : index
    %c0_0 = arith.constant 0 : index
    %0 = vector.load %arg1[%c0, %c0_0] : memref<256x32xf32, #tpu.memory_space<vmem>>, vector<256x32xf32>
    %c0_1 = arith.constant 0 : index
    %c0_2 = arith.constant 0 : index
    %1 = vector.load %arg2[%c0_1, %c0_2] : memref<32x128xbf16, #tpu.memory_space<vmem>>, vector<32x128xbf16>
    %c0_3 = arith.constant 0 : index
    %c0_4 = arith.constant 0 : index
    %2 = vector.load %arg3[%c0_3, %c0_4] : memref<1x128xf32, #tpu.memory_space<vmem>>, vector<1x128xf32>
    %3 = arith.truncf %0 : vector<256x32xf32> to vector<256x32xbf16>
    %cst = arith.constant dense<0.000000e+00> : vector<256x128xf32>
    %4 = tpu.matmul %3, %1, %cst {dimension_numbers = #tpu.dot_dimension_numbers<[1], [0], [0], [1], [0, 0, 1, 1], [], []>} : vector<256x32xbf16>, vector<32x128xbf16>, vector<256x128xf32> -> vector<256x128xf32>
    %5 = vector.broadcast %2 : vector<1x128xf32> to vector<256x128xf32>
    %6 = arith.addf %4, %5 : vector<256x128xf32>
    %cst_5 = arith.constant 0.000000e+00 : f32
    %7 = vector.broadcast %cst_5 : f32 to vector<256x128xf32>
    %8 = arith.maximumf %6, %7 : vector<256x128xf32>
    %c0_6 = arith.constant 0 : index
    %c0_7 = arith.constant 0 : index
    %9 = vector.load %arg4[%c0_6, %c0_7] : memref<128x128xbf16, #tpu.memory_space<vmem>>, vector<128x128xbf16>
    %c0_8 = arith.constant 0 : index
    %c0_9 = arith.constant 0 : index
    %10 = vector.load %arg5[%c0_8, %c0_9] : memref<1x128xf32, #tpu.memory_space<vmem>>, vector<1x128xf32>
    %11 = arith.truncf %8 : vector<256x128xf32> to vector<256x128xbf16>
    %cst_10 = arith.constant dense<0.000000e+00> : vector<256x128xf32>
    %12 = tpu.matmul %11, %9, %cst_10 {dimension_numbers = #tpu.dot_dimension_numbers<[1], [0], [0], [1], [0, 0, 1, 1], [], []>} : vector<256x128xbf16>, vector<128x128xbf16>, vector<256x128xf32> -> vector<256x128xf32>
    %13 = vector.broadcast %10 : vector<1x128xf32> to vector<256x128xf32>
    %14 = arith.addf %12, %13 : vector<256x128xf32>
    %cst_11 = arith.constant 0.000000e+00 : f32
    %15 = vector.broadcast %cst_11 : f32 to vector<256x128xf32>
    %16 = arith.maximumf %14, %15 : vector<256x128xf32>
    %c0_12 = arith.constant 0 : index
    %c0_13 = arith.constant 0 : index
    %17 = vector.load %arg6[%c0_12, %c0_13] : memref<128x128xbf16, #tpu.memory_space<vmem>>, vector<128x128xbf16>
    %c0_14 = arith.constant 0 : index
    %c0_15 = arith.constant 0 : index
    %18 = vector.load %arg7[%c0_14, %c0_15] : memref<1x128xf32, #tpu.memory_space<vmem>>, vector<1x128xf32>
    %19 = arith.truncf %16 : vector<256x128xf32> to vector<256x128xbf16>
    %cst_16 = arith.constant dense<0.000000e+00> : vector<256x128xf32>
    %20 = tpu.matmul %19, %17, %cst_16 {dimension_numbers = #tpu.dot_dimension_numbers<[1], [0], [0], [1], [0, 0, 1, 1], [], []>} : vector<256x128xbf16>, vector<128x128xbf16>, vector<256x128xf32> -> vector<256x128xf32>
    %21 = vector.broadcast %18 : vector<1x128xf32> to vector<256x128xf32>
    %22 = arith.addf %20, %21 : vector<256x128xf32>
    %c0_17 = arith.constant 0 : index
    %c0_18 = arith.constant 0 : index
    %23 = vector.load %arg8[%c0_17, %c0_18] : memref<128x128xbf16, #tpu.memory_space<vmem>>, vector<128x128xbf16>
    %c0_19 = arith.constant 0 : index
    %c0_20 = arith.constant 0 : index
    %24 = vector.load %arg9[%c0_19, %c0_20] : memref<1x128xf32, #tpu.memory_space<vmem>>, vector<1x128xf32>
    %25 = arith.truncf %22 : vector<256x128xf32> to vector<256x128xbf16>
    %cst_21 = arith.constant dense<0.000000e+00> : vector<256x128xf32>
    %26 = tpu.matmul %25, %23, %cst_21 {dimension_numbers = #tpu.dot_dimension_numbers<[1], [0], [0], [1], [0, 0, 1, 1], [], []>} : vector<256x128xbf16>, vector<128x128xbf16>, vector<256x128xf32> -> vector<256x128xf32>
    %27 = vector.broadcast %24 : vector<1x128xf32> to vector<256x128xf32>
    %28 = arith.addf %26, %27 : vector<256x128xf32>
    %cst_22 = arith.constant 0.000000e+00 : f32
    %29 = vector.broadcast %cst_22 : f32 to vector<256x128xf32>
    %30 = arith.maximumf %28, %29 : vector<256x128xf32>
    %c0_23 = arith.constant 0 : index
    %c0_24 = arith.constant 0 : index
    %31 = vector.load %arg10[%c0_23, %c0_24] : memref<128x128xbf16, #tpu.memory_space<vmem>>, vector<128x128xbf16>
    %c0_25 = arith.constant 0 : index
    %c0_26 = arith.constant 0 : index
    %32 = vector.load %arg11[%c0_25, %c0_26] : memref<1x128xf32, #tpu.memory_space<vmem>>, vector<1x128xf32>
    %33 = arith.truncf %30 : vector<256x128xf32> to vector<256x128xbf16>
    %cst_27 = arith.constant dense<0.000000e+00> : vector<256x128xf32>
    %34 = tpu.matmul %33, %31, %cst_27 {dimension_numbers = #tpu.dot_dimension_numbers<[1], [0], [0], [1], [0, 0, 1, 1], [], []>} : vector<256x128xbf16>, vector<128x128xbf16>, vector<256x128xf32> -> vector<256x128xf32>
    %35 = vector.broadcast %32 : vector<1x128xf32> to vector<256x128xf32>
    %36 = arith.addf %34, %35 : vector<256x128xf32>
    %cst_28 = arith.constant 0.000000e+00 : f32
    %37 = vector.broadcast %cst_28 : f32 to vector<256x128xf32>
    %38 = arith.maximumf %36, %37 : vector<256x128xf32>
    %c0_29 = arith.constant 0 : index
    %c0_30 = arith.constant 0 : index
    %39 = vector.load %arg12[%c0_29, %c0_30] : memref<128x128xbf16, #tpu.memory_space<vmem>>, vector<128x128xbf16>
    %c0_31 = arith.constant 0 : index
    %c0_32 = arith.constant 0 : index
    %40 = vector.load %arg13[%c0_31, %c0_32] : memref<1x128xf32, #tpu.memory_space<vmem>>, vector<1x128xf32>
    %41 = arith.truncf %38 : vector<256x128xf32> to vector<256x128xbf16>
    %cst_33 = arith.constant dense<0.000000e+00> : vector<256x128xf32>
    %42 = tpu.matmul %41, %39, %cst_33 {dimension_numbers = #tpu.dot_dimension_numbers<[1], [0], [0], [1], [0, 0, 1, 1], [], []>} : vector<256x128xbf16>, vector<128x128xbf16>, vector<256x128xf32> -> vector<256x128xf32>
    %43 = vector.broadcast %40 : vector<1x128xf32> to vector<256x128xf32>
    %44 = arith.addf %42, %43 : vector<256x128xf32>
    %45 = arith.negf %44 : vector<256x128xf32>
    %46 = math.exp %45 : vector<256x128xf32>
    %cst_34 = arith.constant 1.000000e+00 : f32
    %47 = vector.broadcast %cst_34 : f32 to vector<256x128xf32>
    %48 = arith.addf %47, %46 : vector<256x128xf32>
    %49 = arith.divf %47, %48 : vector<256x128xf32>
    %c0_35 = arith.constant 0 : index
    %c0_36 = arith.constant 0 : index
    %50 = vector.load %arg14[%c0_35, %c0_36] : memref<256x128xf32, #tpu.memory_space<vmem>>, vector<256x128xf32>
    tpu.vector_store %arg14[%c0_35, %c0_36], %49 {strides = array<i32>} : memref<256x128xf32, #tpu.memory_space<vmem>>, vector<256x128xf32>,
    return
  }
  func.func @transform_0(%arg0: i32) -> (i32, i32) {
    %c0_i32 = arith.constant 0 : i32
    %c0_i32_0 = arith.constant 0 : i32
    return %arg0, %c0_i32 : i32, i32
  }
  func.func @transform_1(%arg0: i32) -> (i32, i32) {
    %c0_i32 = arith.constant 0 : i32
    %c0_i32_0 = arith.constant 0 : i32
    %c0_i32_1 = arith.constant 0 : i32
    return %c0_i32, %c0_i32_0 : i32, i32
  }
  func.func @transform_2(%arg0: i32) -> (i32, i32) {
    %c0_i32 = arith.constant 0 : i32
    %c0_i32_0 = arith.constant 0 : i32
    %c0_i32_1 = arith.constant 0 : i32
    return %c0_i32, %c0_i32_0 : i32, i32
  }
  func.func @transform_3(%arg0: i32) -> (i32, i32) {
    %c0_i32 = arith.constant 0 : i32
    %c0_i32_0 = arith.constant 0 : i32
    %c0_i32_1 = arith.constant 0 : i32
    return %c0_i32, %c0_i32_0 : i32, i32
  }
  func.func @transform_4(%arg0: i32) -> (i32, i32) {
    %c0_i32 = arith.constant 0 : i32
    %c0_i32_0 = arith.constant 0 : i32
    %c0_i32_1 = arith.constant 0 : i32
    return %c0_i32, %c0_i32_0 : i32, i32
  }
  func.func @transform_5(%arg0: i32) -> (i32, i32) {
    %c0_i32 = arith.constant 0 : i32
    %c0_i32_0 = arith.constant 0 : i32
    %c0_i32_1 = arith.constant 0 : i32
    return %c0_i32, %c0_i32_0 : i32, i32
  }
  func.func @transform_6(%arg0: i32) -> (i32, i32) {
    %c0_i32 = arith.constant 0 : i32
    %c0_i32_0 = arith.constant 0 : i32
    %c0_i32_1 = arith.constant 0 : i32
    return %c0_i32, %c0_i32_0 : i32, i32
  }
  func.func @transform_7(%arg0: i32) -> (i32, i32) {
    %c0_i32 = arith.constant 0 : i32
    %c0_i32_0 = arith.constant 0 : i32
    %c0_i32_1 = arith.constant 0 : i32
    return %c0_i32, %c0_i32_0 : i32, i32
  }
  func.func @transform_8(%arg0: i32) -> (i32, i32) {
    %c0_i32 = arith.constant 0 : i32
    %c0_i32_0 = arith.constant 0 : i32
    %c0_i32_1 = arith.constant 0 : i32
    return %c0_i32, %c0_i32_0 : i32, i32
  }
  func.func @transform_9(%arg0: i32) -> (i32, i32) {
    %c0_i32 = arith.constant 0 : i32
    %c0_i32_0 = arith.constant 0 : i32
    %c0_i32_1 = arith.constant 0 : i32
    return %c0_i32, %c0_i32_0 : i32, i32
  }
  func.func @transform_10(%arg0: i32) -> (i32, i32) {
    %c0_i32 = arith.constant 0 : i32
    %c0_i32_0 = arith.constant 0 : i32
    %c0_i32_1 = arith.constant 0 : i32
    return %c0_i32, %c0_i32_0 : i32, i32
  }
  func.func @transform_11(%arg0: i32) -> (i32, i32) {
    %c0_i32 = arith.constant 0 : i32
    %c0_i32_0 = arith.constant 0 : i32
    %c0_i32_1 = arith.constant 0 : i32
    return %c0_i32, %c0_i32_0 : i32, i32
  }
  func.func @transform_12(%arg0: i32) -> (i32, i32) {
    %c0_i32 = arith.constant 0 : i32
    %c0_i32_0 = arith.constant 0 : i32
    %c0_i32_1 = arith.constant 0 : i32
    return %c0_i32, %c0_i32_0 : i32, i32
  }
  func.func @transform_13(%arg0: i32) -> (i32, i32) {
    %c0_i32 = arith.constant 0 : i32
    %c0_i32_0 = arith.constant 0 : i32
    return %arg0, %c0_i32 : i32, i32
  }
}

</mosaic_0001>

<bundles_post_ra>
// kernel: tpu_custom_call.1
= control target key start
LH: loop header
LB: loop body
LE: loop exit
PB: predicated region body
PF: predicated region fallthrough
CT: control target
= control target key end

     0   :  { %18 = vsyncpa [#allocation3], 0  ;;  %s3250_s0 = inlined_call_operand.vmem [shape: f32[256,32], index: 0, kind: input, shape index: {}]   ;;  %s3251_s1 = inlined_call_operand.hbm [shape: bf16[32,128], index: 1, kind: input, shape index: {}]   ;;  %s3252_s2 = inlined_call_operand.vmem [shape: f32[1,128], index: 2, kind: input, shape index: {}]   ;;  %s3253_s3 = inlined_call_operand.vmem [shape: bf16[128,128], index: 3, kind: input, shape index: {}]   ;;  %s3254_s4 = inlined_call_operand.vmem [shape: f32[1,128], index: 4, kind: input, shape index: {}]   ;;  %s3255_s5 = inlined_call_operand.vmem [shape: bf16[128,128], index: 5, kind: input, shape index: {}]   ;;  %s3256_s6 = inlined_call_operand.vmem [shape: f32[1,128], index: 6, kind: input, shape index: {}]   ;;  %s3257_s7 = inlined_call_operand.vmem [shape: bf16[128,128], index: 7, kind: input, shape index: {}]   ;;  %s3258_s8 = inlined_call_operand.vmem [shape: f32[1,128], index: 8, kind: input, shape index: {}]   ;;  %s3259_s9 = inlined_call_operand.vmem [shape: bf16[128,128], index: 9, kind: input, shape index: {}]   ;;  %s3260_s10 = inlined_call_operand.vmem [shape: f32[1,128], index: 10, kind: input, shape index: {}]   ;;  %s3261_s11 = inlined_call_operand.vmem [shape: bf16[128,128], index: 11, kind: input, shape index: {}]   ;;  %s3262_s12 = inlined_call_operand.vmem [shape: f32[1,128], index: 12, kind: input, shape index: {}]   ;;  %s3263_s13 = inlined_call_operand.hbm [shape: f32[256,128], index: 13, kind: output, shape index: {}]  }
   0x1   :  { %19 = vsyncpa [#allocation4], 0  ;;  %s2696_s25 = smov [#allocation2]  }
   0x2   :  { %s27_s26 = sshll.u32 %s2696_s25, 4  ;;  %s28_s26 = int_to_ptr.vmem [resolvable:$true] %s27_s26 }
   0x3   :  { %s2660_s27 = scalar_lea.vmem %s28_s26, 256  ;;  %p2665_p1 = scmp.lt.s32.totalorder %s28_s26, %s28_s26 }
   0x4   :  { %p2661_p0 = scmp.ne.s32.totalorder %s28_s26, %s2660_s27  ;;  %p2666_p2 = scmp.lt.s32.totalorder %s2660_s27, %s2660_s27 }
   0x6   :  { %p2667_p3 = por %p2666_p2, %p2665_p1 }
   0x8   :  { %p2668_p4 = pnand %p2667_p3, %p2661_p0 }
   0xa   :  { %2671 = shalt.err (!%p2668_p4)
}
   0xb   :  { %s2697_s28 = smov 64   ;;  %s2698_s29 = smov 4  }
   0xc   :  { %33 = dma.hbm_to_vmem [thread:$0]  %s3251_s1, 256, %s28_s26, [#allocation3], %s2697_s28, %s2697_s28, %s2698_s29  }
   0xd   :  { %2692 = dma.done.wait [#allocation3], 256  }
   0xe   :  { %2693 = vsyncadd [#allocation3], 4294967040  ;;  %v2482_v0 = vld [vmem:[#allocation2 + $0x8] sm:$0xff]   ;;  %v2483_v1 = vld [vmem:[#allocation2] sm:$0xff]   ;;  %vm131_vm0 = vcmask 261120  }
   0xf   :  { %2184 = vmatprep.subr.bf16.mxu0 %v2482_v0  ;;  %v60_v2 = vld [vmem:[%s3250_s0] sm:$0xff]  ;;  %v61_v3 = vld [vmem:[%s3250_s0 + $0x8] sm:$0xff]  ;;  %v62_v5 = vld [vmem:[%s3250_s0 + $0x10] sm:$0xff] }
  0x10   :  { %2185 = vmatpush3.bf16.msra.mxu0 %v2482_v0  ;;  %v97_v4 = vpack.c.bf16 %v61_v3, %v60_v2  ;;  %v63_v6 = vld [vmem:[%s3250_s0 + $0x18] sm:$0xff]  ;;  %v64_v7 = vld [vmem:[%s3250_s0 + $0x20] sm:$0xff]  ;;  %v65_v8 = vld [vmem:[%s3250_s0 + $0x28] sm:$0xff] }
  0x11   :  { %2186 = vmatprep.subr.bf16.mxu0 %v2483_v1  ;;  %v98_v9 = vpack.c.bf16 %v63_v6, %v62_v5  ;;  %v99_v10 = vpack.c.bf16 %v65_v8, %v64_v7  ;;  %v66_v11 = vld [vmem:[%s3250_s0 + $0x30] sm:$0xff]  ;;  %v67_v12 = vld [vmem:[%s3250_s0 + $0x38] sm:$0xff]  ;;  %v68_v13 = vld [vmem:[%s3250_s0 + $0x40] sm:$0xff] }
  0x12   :  { %2188 = vmatprep.mubr.msk.bf16.mxu0 %vm131_vm0, %v97_v4  ;;  %v69_v14 = vld [vmem:[%s3250_s0 + $0x48] sm:$0xff]  ;;  %v2484_v15 = vld [vmem:[%s3253_s3 + $0x38] sm:$0xff]   ;;  %v100_v16 = vpack.c.bf16 %v67_v12, %v66_v11  ;;  %v2485_v17 = vld [vmem:[%s3253_s3 + $0x30] sm:$0xff]  }
  0x13   :  { %v101_v18 = vpack.c.bf16 %v69_v14, %v68_v13  ;;  %2220 = vmatprep.subr.bf16.mxu1 %v2484_v15  ;;  %v70_v19 = vld [vmem:[%s3250_s0 + $0x50] sm:$0xff]  ;;  %v71_v20 = vld [vmem:[%s3250_s0 + $0x58] sm:$0xff]  ;;  %v2486_v21 = vld [vmem:[%s3253_s3 + $0x28] sm:$0xff]  }
  0x14   :  { %2187 = vmatpush3.bf16.msra.mxu0 %v2483_v1  ;;  %2221 = vmatpush3.bf16.msra.mxu1 %v2484_v15  ;;  %v72_v22 = vld [vmem:[%s3250_s0 + $0x60] sm:$0xff]  ;;  %v73_v23 = vld [vmem:[%s3250_s0 + $0x68] sm:$0xff]  ;;  %v102_v25 = vpack.c.bf16 %v71_v20, %v70_v19  ;;  %v2488_v27 = vld [vmem:[%s3253_s3 + $0x18] sm:$0xff]  }
  0x15   :  { %2222 = vmatprep.subr.bf16.mxu1 %v2485_v17  ;;  %v2487_v24 = vld [vmem:[%s3253_s3 + $0x20] sm:$0xff]   ;;  %v103_v26 = vpack.c.bf16 %v73_v23, %v72_v22  ;;  %v74_v28 = vld [vmem:[%s3250_s0 + $0x70] sm:$0xff]  ;;  %v75_v29 = vld [vmem:[%s3250_s0 + $0x78] sm:$0xff] }
  0x16   :  { %v76_v30 = vld [vmem:[%s3250_s0 + $0x80] sm:$0xff]  ;;  %v77_v31 = vld [vmem:[%s3250_s0 + $0x88] sm:$0xff]  ;;  %v104_v32 = vpack.c.bf16 %v75_v29, %v74_v28  ;;  %v78_v34 = vld [vmem:[%s3250_s0 + $0x90] sm:$0xff] }
  0x17   :  { %2189 = vmatmul.mubr.msk.bf16.vlgmr.msra.gmra.mxu0 %vm131_vm0, %v98_v9  ;;  %v105_v33 = vpack.c.bf16 %v77_v31, %v76_v30  ;;  %v79_v35 = vld [vmem:[%s3250_s0 + $0x98] sm:$0xff]  ;;  %v80_v36 = vld [vmem:[%s3250_s0 + $0xa0] sm:$0xff]  ;;  %v81_v37 = vld [vmem:[%s3250_s0 + $0xa8] sm:$0xff] }
  0x18   :  { %2192 = vmatprep.mubr.msk.bf16.mxu0 %vm131_vm0, %v99_v10  ;;  %2223 = vmatpush3.bf16.msra.mxu1 %v2485_v17  ;;  %v106_v38 = vpack.c.bf16 %v79_v35, %v78_v34  ;;  %v107_v39 = vpack.c.bf16 %v81_v37, %v80_v36  ;;  %v82_v40 = vld [vmem:[%s3250_s0 + $0xb0] sm:$0xff]  ;;  %v83_v41 = vld [vmem:[%s3250_s0 + $0xb8] sm:$0xff]  ;;  %v84_v42 = vld [vmem:[%s3250_s0 + $0xc0] sm:$0xff] }
  0x19   :  { %2224 = vmatprep.subr.bf16.mxu1 %v2486_v21  ;;  %v85_v43 = vld [vmem:[%s3250_s0 + $0xc8] sm:$0xff]  ;;  %v108_v44 = vpack.c.bf16 %v83_v41, %v82_v40  ;;  %v86_v46 = vld [vmem:[%s3250_s0 + $0xd0] sm:$0xff]  ;;  %v87_v47 = vld [vmem:[%s3250_s0 + $0xd8] sm:$0xff] }
  0x1a   :  { %v109_v45 = vpack.c.bf16 %v85_v43, %v84_v42  ;;  %v88_v48 = vld [vmem:[%s3250_s0 + $0xe0] sm:$0xff]  ;;  %v89_v49 = vld [vmem:[%s3250_s0 + $0xe8] sm:$0xff]  ;;  %v110_v50 = vpack.c.bf16 %v87_v47, %v86_v46  ;;  %v90_v52 = vld [vmem:[%s3250_s0 + $0xf0] sm:$0xff] }
  0x1b   :  { %v111_v51 = vpack.c.bf16 %v89_v49, %v88_v48  ;;  %v91_v53 = vld [vmem:[%s3250_s0 + $0xf8] sm:$0xff]  ;;  %v2489_v55 = vld [vmem:[%s3253_s3 + $0x10] sm:$0xff]   ;;  %v2490_v56 = vld [vmem:[%s3253_s3 + $0x8] sm:$0xff]  }
  0x1c   :  { %2225 = vmatpush3.bf16.msra.mxu1 %v2486_v21  ;;  %v112_v54 = vpack.c.bf16 %v91_v53, %v90_v52  ;;  %v2491_v57 = vld [vmem:[%s3253_s3] sm:$0xff]   ;;  %v2492_v58 = vld [vmem:[%s3255_s5 + $0x38] sm:$0xff]   ;;  %v2493_v59 = vld [vmem:[%s3255_s5 + $0x30] sm:$0xff]  }
  0x1d   :  { %2226 = vmatprep.subr.bf16.mxu1 %v2487_v24  ;;  %2268 = vmatprep.subr.bf16.mxu0 %v2492_v58  ;;  %v2494_v60 = vld [vmem:[%s3255_s5 + $0x28] sm:$0xff]   ;;  %v2495_v61 = vld [vmem:[%s3255_s5 + $0x20] sm:$0xff]   ;;  %v2496_v62 = vld [vmem:[%s3255_s5 + $0x18] sm:$0xff]  }
  0x1e   :  { %2269 = vmatpush3.bf16.msra.mxu0 %v2492_v58  ;;  %v2497_v63 = vld [vmem:[%s3255_s5 + $0x10] sm:$0xff]   ;;  %v2498_v0 = vld [vmem:[%s3255_s5 + $0x8] sm:$0xff]   ;;  %v2935_v3 = vld [vmem:[%s3252_s2] ss:$0 sm:$0xff] }
  0x1f   :  { %2193 = vmatmul.mubr.msk.bf16.gmra.mxu0 %vm131_vm0, %v100_v16  ;;  %2270 = vmatprep.subr.bf16.mxu0 %v2493_v59 }
  0x20   :  { %2196 = vmatprep.mubr.msk.bf16.mxu0 %vm131_vm0, %v101_v18  ;;  %2227 = vmatpush3.bf16.msra.mxu1 %v2487_v24 }
  0x21   :  { %2228 = vmatprep.subr.bf16.mxu1 %v2488_v27 }
  0x22   :  { %2271 = vmatpush3.bf16.msra.mxu0 %v2493_v59 }
  0x23   :  { %2272 = vmatprep.subr.bf16.mxu0 %v2494_v60 }
  0x24   :  { %2229 = vmatpush3.bf16.msra.mxu1 %v2488_v27 }
  0x25   :  { %2230 = vmatprep.subr.bf16.mxu1 %v2489_v55 }
  0x26   :  { %2273 = vmatpush3.bf16.msra.mxu0 %v2494_v60 }
  0x27   :  { %2197 = vmatmul.mubr.msk.bf16.gmra.mxu0 %vm131_vm0, %v102_v25  ;;  %2274 = vmatprep.subr.bf16.mxu0 %v2495_v61 }
  0x28   :  { %2200 = vmatprep.mubr.msk.bf16.mxu0 %vm131_vm0, %v103_v26  ;;  %2231 = vmatpush3.bf16.msra.mxu1 %v2489_v55 }
  0x29   :  { %2232 = vmatprep.subr.bf16.mxu1 %v2490_v56 }
  0x2a   :  { %2275 = vmatpush3.bf16.msra.mxu0 %v2495_v61 }
  0x2b   :  { %2276 = vmatprep.subr.bf16.mxu0 %v2496_v62 }
  0x2c   :  { %2233 = vmatpush3.bf16.msra.mxu1 %v2490_v56 }
  0x2d   :  { %2234 = vmatprep.subr.bf16.mxu1 %v2491_v57 }
  0x2e   :  { %2277 = vmatpush3.bf16.msra.mxu0 %v2496_v62 }
  0x2f   :  { %2201 = vmatmul.mubr.msk.bf16.gmra.mxu0 %vm131_vm0, %v104_v32  ;;  %2278 = vmatprep.subr.bf16.mxu0 %v2497_v63 }
  0x30   :  { %2204 = vmatprep.mubr.msk.bf16.mxu0 %vm131_vm0, %v105_v33  ;;  %2235 = vmatpush3.bf16.msra.mxu1 %v2491_v57 }
  0x32   :  { %2279 = vmatpush3.bf16.msra.mxu0 %v2497_v63 }
  0x33   :  { %2280 = vmatprep.subr.bf16.mxu0 %v2498_v0 }
  0x36   :  { %2281 = vmatpush3.bf16.msra.mxu0 %v2498_v0 }
  0x37   :  { %2205 = vmatmul.mubr.msk.bf16.gmra.mxu0 %vm131_vm0, %v106_v38 }
  0x38   :  { %2208 = vmatprep.mubr.msk.bf16.mxu0 %vm131_vm0, %v107_v39 }
  0x3f   :  { %2209 = vmatmul.mubr.msk.bf16.gmra.mxu0 %vm131_vm0, %v108_v44 }
  0x40   :  { %2212 = vmatprep.mubr.msk.bf16.mxu0 %vm131_vm0, %v109_v45 }
  0x47   :  { %2213 = vmatmul.mubr.msk.bf16.gmra.mxu0 %vm131_vm0, %v110_v50 }
  0x48   :  { %2216 = vmatprep.mubr.msk.bf16.mxu0 %vm131_vm0, %v111_v51 }
  0x4f   :  { %2217 = vmatmul.mubr.msk.bf16.gmra.mxu0 %vm131_vm0, %v112_v54 }
  0xd7   :  { %v2190_v1 = vpop.f32.mrf.mxu0 }
  0xd8   :  { %v223_v7 = vadd.f32 %v2190_v1, %v2935_v3 }
  0xd9   :  { %v214_v2 = vpop.f32.mrf.mxu0 }
  0xda   :  { %v215_v5 = vadd.f32 %v2935_v3, %v214_v2  ;;  %v343_v14 = vmax.f32 %v223_v7, 0.0 }
  0xdb   :  { %v2191_v4 = vpop.f32.mrf.mxu0 }
  0xdc   :  { %v226_v6 = vadd.f32 %v2191_v4, %v2935_v3  ;;  %v341_v12 = vmax.f32 %v215_v5, 0.0 }
  0xdd   :  { %v217_v8 = vpop.f32.mrf.mxu0 }
  0xde   :  { %v218_v9 = vadd.f32 %v2935_v3, %v217_v8  ;;  %v344_v10 = vmax.f32 %v226_v6, 0.0 }
  0xdf   :  { %v2194_v11 = vpop.f32.mrf.mxu0 }
  0xe0   :  { %v342_v13 = vmax.f32 %v218_v9, 0.0  ;;  %v391_v17 = vpack.c.bf16 %v344_v10, %v343_v14  ;;  %v239_v21 = vadd.f32 %v2194_v11, %v2935_v3 }
  0xe1   :  { %v230_v15 = vpop.f32.mrf.mxu0 }
  0xe2   :  { %v390_v16 = vpack.c.bf16 %v342_v13, %v341_v12  ;;  %v231_v19 = vadd.f32 %v2935_v3, %v230_v15  ;;  %v347_v28 = vmax.f32 %v239_v21, 0.0 }
  0xe3   :  { %v2195_v18 = vpop.f32.mrf.mxu0 }
  0xe4   :  { %v242_v20 = vadd.f32 %v2195_v18, %v2935_v3  ;;  %2236 = vmatprep.mubr.bf16.mxu1 %v390_v16  ;;  %v345_v26 = vmax.f32 %v231_v19, 0.0 }
  0xe5   :  { %v233_v22 = vpop.f32.mrf.mxu0  ;;  %2237 = vmatmul.mubr.bf16.vlgmr.msra.gmra.mxu1 %v391_v17 }
  0xe6   :  { %v234_v23 = vadd.f32 %v2935_v3, %v233_v22  ;;  %v348_v24 = vmax.f32 %v242_v20, 0.0 }
  0xe7   :  { %v2198_v25 = vpop.f32.mrf.mxu0 }
  0xe8   :  { %v346_v27 = vmax.f32 %v234_v23, 0.0  ;;  %v393_v31 = vpack.c.bf16 %v348_v24, %v347_v28  ;;  %v255_v35 = vadd.f32 %v2198_v25, %v2935_v3 }
  0xe9   :  { %v246_v29 = vpop.f32.mrf.mxu0 }
  0xea   :  { %v392_v30 = vpack.c.bf16 %v346_v27, %v345_v26  ;;  %v247_v33 = vadd.f32 %v2935_v3, %v246_v29  ;;  %v351_v42 = vmax.f32 %v255_v35, 0.0 }
  0xeb   :  { %v2199_v32 = vpop.f32.mrf.mxu0 }
  0xec   :  { %v258_v34 = vadd.f32 %v2199_v32, %v2935_v3  ;;  %2240 = vmatprep.mubr.bf16.mxu1 %v392_v30  ;;  %v349_v40 = vmax.f32 %v247_v33, 0.0 }
  0xed   :  { %v249_v36 = vpop.f32.mrf.mxu0  ;;  %2241 = vmatmul.mubr.bf16.gmra.mxu1 %v393_v31 }
  0xee   :  { %v250_v37 = vadd.f32 %v2935_v3, %v249_v36  ;;  %v352_v38 = vmax.f32 %v258_v34, 0.0 }
  0xef   :  { %v2202_v39 = vpop.f32.mrf.mxu0 }
  0xf0   :  { %v350_v41 = vmax.f32 %v250_v37, 0.0  ;;  %v395_v45 = vpack.c.bf16 %v352_v38, %v351_v42  ;;  %v271_v49 = vadd.f32 %v2202_v39, %v2935_v3 }
  0xf1   :  { %v262_v43 = vpop.f32.mrf.mxu0 }
  0xf2   :  { %v394_v44 = vpack.c.bf16 %v350_v41, %v349_v40  ;;  %v263_v47 = vadd.f32 %v2935_v3, %v262_v43  ;;  %v355_v56 = vmax.f32 %v271_v49, 0.0 }
  0xf3   :  { %v2203_v46 = vpop.f32.mrf.mxu0 }
  0xf4   :  { %v274_v48 = vadd.f32 %v2203_v46, %v2935_v3  ;;  %2244 = vmatprep.mubr.bf16.mxu1 %v394_v44  ;;  %v353_v54 = vmax.f32 %v263_v47, 0.0 }
  0xf5   :  { %v265_v50 = vpop.f32.mrf.mxu0  ;;  %2245 = vmatmul.mubr.bf16.gmra.mxu1 %v395_v45 }
  0xf6   :  { %v266_v51 = vadd.f32 %v2935_v3, %v265_v50  ;;  %v356_v52 = vmax.f32 %v274_v48, 0.0 }
  0xf7   :  { %v2206_v53 = vpop.f32.mrf.mxu0 }
  0xf8   :  { %v354_v55 = vmax.f32 %v266_v51, 0.0  ;;  %v397_v59 = vpack.c.bf16 %v356_v52, %v355_v56  ;;  %v287_v63 = vadd.f32 %v2206_v53, %v2935_v3  ;;  %v2499_v51 = vld [vmem:[%s3255_s5] sm:$0xff]   ;;  %v2500_v52 = vld [vmem:[%s3257_s7 + $0x38] sm:$0xff]   ;;  %v2502_v53 = vld [vmem:[%s3257_s7 + $0x28] sm:$0xff]  }
  0xf9   :  { %v278_v57 = vpop.f32.mrf.mxu0  ;;  %2282 = vmatprep.subr.bf16.mxu0 %v2499_v51  ;;  %2316 = vmatprep.subr.bf16.mxu1 %v2500_v52  ;;  %v2505_v56 = vld [vmem:[%s3257_s7 + $0x10] sm:$0xff]  }
  0xfa   :  { %v396_v58 = vpack.c.bf16 %v354_v55, %v353_v54  ;;  %v279_v61 = vadd.f32 %v2935_v3, %v278_v57  ;;  %v359_v7 = vmax.f32 %v287_v63, 0.0  ;;  %2283 = vmatpush3.bf16.msra.mxu0 %v2499_v51  ;;  %2317 = vmatpush3.bf16.msra.mxu1 %v2500_v52  ;;  %v2503_v54 = vld [vmem:[%s3257_s7 + $0x20] sm:$0xff]   ;;  %v2504_v55 = vld [vmem:[%s3257_s7 + $0x18] sm:$0xff]   ;;  %v2506_v57 = vld [vmem:[%s3257_s7 + $0x8] sm:$0xff]  }
  0xfb   :  { %v2207_v60 = vpop.f32.mrf.mxu0 }
  0xfc   :  { %v290_v62 = vadd.f32 %v2207_v60, %v2935_v3  ;;  %2248 = vmatprep.mubr.bf16.mxu1 %v396_v58  ;;  %v357_v5 = vmax.f32 %v279_v61, 0.0  ;;  %v2996_v60 = vld [vmem:[%s3254_s4] ss:$0 sm:$0xff] }
  0xfd   :  { %v281_v0 = vpop.f32.mrf.mxu0  ;;  %2249 = vmatmul.mubr.bf16.gmra.mxu1 %v397_v59 }
  0xfe   :  { %v282_v1 = vadd.f32 %v2935_v3, %v281_v0  ;;  %v360_v2 = vmax.f32 %v290_v62, 0.0 }
  0xff   :  { %v2210_v4 = vpop.f32.mrf.mxu0 }
 0x100   :  { %v358_v6 = vmax.f32 %v282_v1, 0.0  ;;  %v399_v10 = vpack.c.bf16 %v360_v2, %v359_v7  ;;  %v303_v14 = vadd.f32 %v2210_v4, %v2935_v3 }
 0x101   :  { %v294_v8 = vpop.f32.mrf.mxu0 }
 0x102   :  { %v398_v9 = vpack.c.bf16 %v358_v6, %v357_v5  ;;  %v295_v12 = vadd.f32 %v2935_v3, %v294_v8  ;;  %v363_v21 = vmax.f32 %v303_v14, 0.0 }
 0x103   :  { %v2211_v11 = vpop.f32.mrf.mxu0 }
 0x104   :  { %v306_v13 = vadd.f32 %v2211_v11, %v2935_v3  ;;  %2252 = vmatprep.mubr.bf16.mxu1 %v398_v9  ;;  %v361_v19 = vmax.f32 %v295_v12, 0.0 }
 0x105   :  { %v297_v15 = vpop.f32.mrf.mxu0  ;;  %2253 = vmatmul.mubr.bf16.gmra.mxu1 %v399_v10 }
 0x106   :  { %v298_v16 = vadd.f32 %v2935_v3, %v297_v15  ;;  %v364_v17 = vmax.f32 %v306_v13, 0.0 }
 0x107   :  { %v2214_v18 = vpop.f32.mrf.mxu0 }
 0x108   :  { %v362_v20 = vmax.f32 %v298_v16, 0.0  ;;  %v401_v24 = vpack.c.bf16 %v364_v17, %v363_v21  ;;  %v319_v28 = vadd.f32 %v2214_v18, %v2935_v3 }
 0x109   :  { %v310_v22 = vpop.f32.mrf.mxu0 }
 0x10a   :  { %v400_v23 = vpack.c.bf16 %v362_v20, %v361_v19  ;;  %v311_v26 = vadd.f32 %v2935_v3, %v310_v22  ;;  %v367_v35 = vmax.f32 %v319_v28, 0.0 }
 0x10b   :  { %v2215_v25 = vpop.f32.mrf.mxu0 }
 0x10c   :  { %v322_v27 = vadd.f32 %v2215_v25, %v2935_v3  ;;  %2256 = vmatprep.mubr.bf16.mxu1 %v400_v23  ;;  %v365_v33 = vmax.f32 %v311_v26, 0.0 }
 0x10d   :  { %v313_v29 = vpop.f32.mrf.mxu0  ;;  %2257 = vmatmul.mubr.bf16.gmra.mxu1 %v401_v24 }
 0x10e   :  { %v314_v30 = vadd.f32 %v2935_v3, %v313_v29  ;;  %v368_v31 = vmax.f32 %v322_v27, 0.0 }
 0x10f   :  { %v2218_v32 = vpop.f32.mrf.mxu0 }
 0x110   :  { %v366_v34 = vmax.f32 %v314_v30, 0.0  ;;  %v403_v38 = vpack.c.bf16 %v368_v31, %v367_v35  ;;  %v335_v42 = vadd.f32 %v2218_v32, %v2935_v3 }
 0x111   :  { %v326_v36 = vpop.f32.mrf.mxu0 }
 0x112   :  { %v402_v37 = vpack.c.bf16 %v366_v34, %v365_v33  ;;  %v327_v40 = vadd.f32 %v2935_v3, %v326_v36  ;;  %v371_v48 = vmax.f32 %v335_v42, 0.0 }
 0x113   :  { %v2219_v39 = vpop.f32.mrf.mxu0 }
 0x114   :  { %v338_v41 = vadd.f32 %v2219_v39, %v2935_v3  ;;  %2260 = vmatprep.mubr.bf16.mxu1 %v402_v37  ;;  %v369_v46 = vmax.f32 %v327_v40, 0.0 }
 0x115   :  { %v329_v43 = vpop.f32.mrf.mxu0  ;;  %2261 = vmatmul.mubr.bf16.gmra.mxu1 %v403_v38 }
 0x116   :  { %v330_v44 = vadd.f32 %v2935_v3, %v329_v43  ;;  %v372_v45 = vmax.f32 %v338_v41, 0.0  ;;  %v2501_v3 = vld [vmem:[%s3257_s7 + $0x30] sm:$0xff]  }
 0x117   :  { %2318 = vmatprep.subr.bf16.mxu1 %v2501_v3 }
 0x118   :  { %v370_v47 = vmax.f32 %v330_v44, 0.0  ;;  %v405_v50 = vpack.c.bf16 %v372_v45, %v371_v48  ;;  %2319 = vmatpush3.bf16.msra.mxu1 %v2501_v3 }
 0x119   :  { %2320 = vmatprep.subr.bf16.mxu1 %v2502_v53 }
 0x11a   :  { %v404_v49 = vpack.c.bf16 %v370_v47, %v369_v46 }
 0x11c   :  { %2264 = vmatprep.mubr.bf16.mxu1 %v404_v49  ;;  %2321 = vmatpush3.bf16.msra.mxu1 %v2502_v53 }
 0x11d   :  { %2265 = vmatmul.mubr.bf16.gmra.mxu1 %v405_v50  ;;  %2322 = vmatprep.subr.bf16.mxu1 %v2503_v54 }
 0x120   :  { %2323 = vmatpush3.bf16.msra.mxu1 %v2503_v54 }
 0x121   :  { %2324 = vmatprep.subr.bf16.mxu1 %v2504_v55 }
 0x124   :  { %2325 = vmatpush3.bf16.msra.mxu1 %v2504_v55 }
 0x125   :  { %2326 = vmatprep.subr.bf16.mxu1 %v2505_v56 }
 0x128   :  { %2327 = vmatpush3.bf16.msra.mxu1 %v2505_v56 }
 0x129   :  { %2328 = vmatprep.subr.bf16.mxu1 %v2506_v57 }
 0x12c   :  { %2329 = vmatpush3.bf16.msra.mxu1 %v2506_v57 }
 0x1a5   :  { %v2238_v58 = vpop.f32.mrf.mxu1 }
 0x1a6   :  { %v503_v0 = vadd.f32 %v2238_v58, %v2996_v60 }
 0x1a7   :  { %v494_v59 = vpop.f32.mrf.mxu1 }
 0x1a8   :  { %v495_v62 = vadd.f32 %v2996_v60, %v494_v59  ;;  %v623_v8 = vmax.f32 %v503_v0, 0.0 }
 0x1a9   :  { %v2239_v61 = vpop.f32.mrf.mxu1 }
 0x1aa   :  { %v506_v63 = vadd.f32 %v2239_v61, %v2996_v60  ;;  %v621_v6 = vmax.f32 %v495_v62, 0.0 }
 0x1ab   :  { %v497_v1 = vpop.f32.mrf.mxu1 }
 0x1ac   :  { %v498_v2 = vadd.f32 %v2996_v60, %v497_v1  ;;  %v624_v4 = vmax.f32 %v506_v63, 0.0 }
 0x1ad   :  { %v2242_v5 = vpop.f32.mrf.mxu1 }
 0x1ae   :  { %v622_v7 = vmax.f32 %v498_v2, 0.0  ;;  %v671_v11 = vpack.c.bf16 %v624_v4, %v623_v8  ;;  %v519_v15 = vadd.f32 %v2242_v5, %v2996_v60 }
 0x1af   :  { %v510_v9 = vpop.f32.mrf.mxu1 }
 0x1b0   :  { %v670_v10 = vpack.c.bf16 %v622_v7, %v621_v6  ;;  %v511_v13 = vadd.f32 %v2996_v60, %v510_v9  ;;  %v627_v22 = vmax.f32 %v519_v15, 0.0 }
 0x1b1   :  { %v2243_v12 = vpop.f32.mrf.mxu1 }
 0x1b2   :  { %v522_v14 = vadd.f32 %v2243_v12, %v2996_v60  ;;  %2284 = vmatprep.mubr.bf16.mxu0 %v670_v10  ;;  %v625_v20 = vmax.f32 %v511_v13, 0.0 }
 0x1b3   :  { %v513_v16 = vpop.f32.mrf.mxu1  ;;  %2285 = vmatmul.mubr.bf16.vlgmr.msra.gmra.mxu0 %v671_v11 }
 0x1b4   :  { %v514_v17 = vadd.f32 %v2996_v60, %v513_v16  ;;  %v628_v18 = vmax.f32 %v522_v14, 0.0 }
 0x1b5   :  { %v2246_v19 = vpop.f32.mrf.mxu1 }
 0x1b6   :  { %v626_v21 = vmax.f32 %v514_v17, 0.0  ;;  %v673_v25 = vpack.c.bf16 %v628_v18, %v627_v22  ;;  %v535_v29 = vadd.f32 %v2246_v19, %v2996_v60 }
 0x1b7   :  { %v526_v23 = vpop.f32.mrf.mxu1 }
 0x1b8   :  { %v672_v24 = vpack.c.bf16 %v626_v21, %v625_v20  ;;  %v527_v27 = vadd.f32 %v2996_v60, %v526_v23  ;;  %v631_v36 = vmax.f32 %v535_v29, 0.0 }
 0x1b9   :  { %v2247_v26 = vpop.f32.mrf.mxu1 }
 0x1ba   :  { %v538_v28 = vadd.f32 %v2247_v26, %v2996_v60  ;;  %2288 = vmatprep.mubr.bf16.mxu0 %v672_v24  ;;  %v629_v34 = vmax.f32 %v527_v27, 0.0 }
 0x1bb   :  { %v529_v30 = vpop.f32.mrf.mxu1  ;;  %2289 = vmatmul.mubr.bf16.gmra.mxu0 %v673_v25 }
 0x1bc   :  { %v530_v31 = vadd.f32 %v2996_v60, %v529_v30  ;;  %v632_v32 = vmax.f32 %v538_v28, 0.0 }
 0x1bd   :  { %v2250_v33 = vpop.f32.mrf.mxu1 }
 0x1be   :  { %v630_v35 = vmax.f32 %v530_v31, 0.0  ;;  %v675_v39 = vpack.c.bf16 %v632_v32, %v631_v36  ;;  %v551_v43 = vadd.f32 %v2250_v33, %v2996_v60 }
 0x1bf   :  { %v542_v37 = vpop.f32.mrf.mxu1 }
 0x1c0   :  { %v674_v38 = vpack.c.bf16 %v630_v35, %v629_v34  ;;  %v543_v41 = vadd.f32 %v2996_v60, %v542_v37  ;;  %v635_v50 = vmax.f32 %v551_v43, 0.0 }
 0x1c1   :  { %v2251_v40 = vpop.f32.mrf.mxu1 }
 0x1c2   :  { %v554_v42 = vadd.f32 %v2251_v40, %v2996_v60  ;;  %2292 = vmatprep.mubr.bf16.mxu0 %v674_v38  ;;  %v633_v48 = vmax.f32 %v543_v41, 0.0 }
 0x1c3   :  { %v545_v44 = vpop.f32.mrf.mxu1  ;;  %2293 = vmatmul.mubr.bf16.gmra.mxu0 %v675_v39 }
 0x1c4   :  { %v546_v45 = vadd.f32 %v2996_v60, %v545_v44  ;;  %v636_v46 = vmax.f32 %v554_v42, 0.0 }
 0x1c5   :  { %v2254_v47 = vpop.f32.mrf.mxu1 }
 0x1c6   :  { %v634_v49 = vmax.f32 %v546_v45, 0.0  ;;  %v677_v3 = vpack.c.bf16 %v636_v46, %v635_v50  ;;  %v567_v56 = vadd.f32 %v2254_v47, %v2996_v60  ;;  %v2507_v45 = vld [vmem:[%s3257_s7] sm:$0xff]   ;;  %v2508_v46 = vld [vmem:[%s3259_s9 + $0x38] sm:$0xff]   ;;  %v2510_v47 = vld [vmem:[%s3259_s9 + $0x28] sm:$0xff]  }
 0x1c7   :  { %v558_v51 = vpop.f32.mrf.mxu1  ;;  %2330 = vmatprep.subr.bf16.mxu1 %v2507_v45  ;;  %2364 = vmatprep.subr.bf16.mxu0 %v2508_v46  ;;  %v2513_v50 = vld [vmem:[%s3259_s9 + $0x10] sm:$0xff]  }
 0x1c8   :  { %v676_v52 = vpack.c.bf16 %v634_v49, %v633_v48  ;;  %v559_v54 = vadd.f32 %v2996_v60, %v558_v51  ;;  %v639_v0 = vmax.f32 %v567_v56, 0.0  ;;  %2331 = vmatpush3.bf16.msra.mxu1 %v2507_v45  ;;  %2365 = vmatpush3.bf16.msra.mxu0 %v2508_v46  ;;  %v2511_v48 = vld [vmem:[%s3259_s9 + $0x20] sm:$0xff]   ;;  %v2512_v49 = vld [vmem:[%s3259_s9 + $0x18] sm:$0xff]   ;;  %v2514_v51 = vld [vmem:[%s3259_s9 + $0x8] sm:$0xff]  }
 0x1c9   :  { %v2255_v53 = vpop.f32.mrf.mxu1 }
 0x1ca   :  { %v570_v55 = vadd.f32 %v2255_v53, %v2996_v60  ;;  %2296 = vmatprep.mubr.bf16.mxu0 %v676_v52  ;;  %v637_v62 = vmax.f32 %v559_v54, 0.0  ;;  %v3057_v54 = vld [vmem:[%s3256_s6] ss:$0 sm:$0xff] }
 0x1cb   :  { %v561_v57 = vpop.f32.mrf.mxu1  ;;  %2297 = vmatmul.mubr.bf16.gmra.mxu0 %v677_v3 }
 0x1cc   :  { %v562_v58 = vadd.f32 %v2996_v60, %v561_v57  ;;  %v640_v59 = vmax.f32 %v570_v55, 0.0 }
 0x1cd   :  { %v2258_v61 = vpop.f32.mrf.mxu1 }
 0x1ce   :  { %v638_v63 = vmax.f32 %v562_v58, 0.0  ;;  %v679_v4 = vpack.c.bf16 %v640_v59, %v639_v0  ;;  %v583_v8 = vadd.f32 %v2258_v61, %v2996_v60 }
 0x1cf   :  { %v574_v1 = vpop.f32.mrf.mxu1 }
 0x1d0   :  { %v678_v2 = vpack.c.bf16 %v638_v63, %v637_v62  ;;  %v575_v6 = vadd.f32 %v2996_v60, %v574_v1  ;;  %v643_v15 = vmax.f32 %v583_v8, 0.0 }
 0x1d1   :  { %v2259_v5 = vpop.f32.mrf.mxu1 }
 0x1d2   :  { %v586_v7 = vadd.f32 %v2259_v5, %v2996_v60  ;;  %2300 = vmatprep.mubr.bf16.mxu0 %v678_v2  ;;  %v641_v13 = vmax.f32 %v575_v6, 0.0 }
 0x1d3   :  { %v577_v9 = vpop.f32.mrf.mxu1  ;;  %2301 = vmatmul.mubr.bf16.gmra.mxu0 %v679_v4 }
 0x1d4   :  { %v578_v10 = vadd.f32 %v2996_v60, %v577_v9  ;;  %v644_v11 = vmax.f32 %v586_v7, 0.0 }
 0x1d5   :  { %v2262_v12 = vpop.f32.mrf.mxu1 }
 0x1d6   :  { %v642_v14 = vmax.f32 %v578_v10, 0.0  ;;  %v681_v18 = vpack.c.bf16 %v644_v11, %v643_v15  ;;  %v599_v22 = vadd.f32 %v2262_v12, %v2996_v60 }
 0x1d7   :  { %v590_v16 = vpop.f32.mrf.mxu1 }
 0x1d8   :  { %v680_v17 = vpack.c.bf16 %v642_v14, %v641_v13  ;;  %v591_v20 = vadd.f32 %v2996_v60, %v590_v16  ;;  %v647_v29 = vmax.f32 %v599_v22, 0.0 }
 0x1d9   :  { %v2263_v19 = vpop.f32.mrf.mxu1 }
 0x1da   :  { %v602_v21 = vadd.f32 %v2263_v19, %v2996_v60  ;;  %2304 = vmatprep.mubr.bf16.mxu0 %v680_v17  ;;  %v645_v27 = vmax.f32 %v591_v20, 0.0 }
 0x1db   :  { %v593_v23 = vpop.f32.mrf.mxu1  ;;  %2305 = vmatmul.mubr.bf16.gmra.mxu0 %v681_v18 }
 0x1dc   :  { %v594_v24 = vadd.f32 %v2996_v60, %v593_v23  ;;  %v648_v25 = vmax.f32 %v602_v21, 0.0 }
 0x1dd   :  { %v2266_v26 = vpop.f32.mrf.mxu1 }
 0x1de   :  { %v646_v28 = vmax.f32 %v594_v24, 0.0  ;;  %v683_v32 = vpack.c.bf16 %v648_v25, %v647_v29  ;;  %v615_v36 = vadd.f32 %v2266_v26, %v2996_v60 }
 0x1df   :  { %v606_v30 = vpop.f32.mrf.mxu1 }
 0x1e0   :  { %v682_v31 = vpack.c.bf16 %v646_v28, %v645_v27  ;;  %v607_v34 = vadd.f32 %v2996_v60, %v606_v30  ;;  %v651_v42 = vmax.f32 %v615_v36, 0.0 }
 0x1e1   :  { %v2267_v33 = vpop.f32.mrf.mxu1 }
 0x1e2   :  { %v618_v35 = vadd.f32 %v2267_v33, %v2996_v60  ;;  %2308 = vmatprep.mubr.bf16.mxu0 %v682_v31  ;;  %v649_v40 = vmax.f32 %v607_v34, 0.0 }
 0x1e3   :  { %v609_v37 = vpop.f32.mrf.mxu1  ;;  %2309 = vmatmul.mubr.bf16.gmra.mxu0 %v683_v32 }
 0x1e4   :  { %v610_v38 = vadd.f32 %v2996_v60, %v609_v37  ;;  %v652_v39 = vmax.f32 %v618_v35, 0.0  ;;  %v2509_v60 = vld [vmem:[%s3259_s9 + $0x30] sm:$0xff]  }
 0x1e5   :  { %2366 = vmatprep.subr.bf16.mxu0 %v2509_v60 }
 0x1e6   :  { %v650_v41 = vmax.f32 %v610_v38, 0.0  ;;  %v685_v44 = vpack.c.bf16 %v652_v39, %v651_v42  ;;  %2367 = vmatpush3.bf16.msra.mxu0 %v2509_v60 }
 0x1e7   :  { %2368 = vmatprep.subr.bf16.mxu0 %v2510_v47 }
 0x1e8   :  { %v684_v43 = vpack.c.bf16 %v650_v41, %v649_v40 }
 0x1ea   :  { %2312 = vmatprep.mubr.bf16.mxu0 %v684_v43  ;;  %2369 = vmatpush3.bf16.msra.mxu0 %v2510_v47 }
 0x1eb   :  { %2313 = vmatmul.mubr.bf16.gmra.mxu0 %v685_v44  ;;  %2370 = vmatprep.subr.bf16.mxu0 %v2511_v48 }
 0x1ee   :  { %2371 = vmatpush3.bf16.msra.mxu0 %v2511_v48 }
 0x1ef   :  { %2372 = vmatprep.subr.bf16.mxu0 %v2512_v49 }
 0x1f2   :  { %2373 = vmatpush3.bf16.msra.mxu0 %v2512_v49 }
 0x1f3   :  { %2374 = vmatprep.subr.bf16.mxu0 %v2513_v50 }
 0x1f6   :  { %2375 = vmatpush3.bf16.msra.mxu0 %v2513_v50 }
 0x1f7   :  { %2376 = vmatprep.subr.bf16.mxu0 %v2514_v51 }
 0x1fa   :  { %2377 = vmatpush3.bf16.msra.mxu0 %v2514_v51 }
 0x273   :  { %v2286_v52 = vpop.f32.mrf.mxu0 }
 0x274   :  { %v783_v59 = vadd.f32 %v2286_v52, %v3057_v54 }
 0x275   :  { %v774_v3 = vpop.f32.mrf.mxu0 }
 0x276   :  { %v775_v57 = vadd.f32 %v3057_v54, %v774_v3 }
 0x277   :  { %v2287_v53 = vpop.f32.mrf.mxu0 }
 0x278   :  { %v786_v55 = vadd.f32 %v2287_v53, %v3057_v54 }
 0x279   :  { %v777_v56 = vpop.f32.mrf.mxu0 }
 0x27a   :  { %v778_v58 = vadd.f32 %v3057_v54, %v777_v56  ;;  %v919_v63 = vpack.c.bf16 %v786_v55, %v783_v59 }
 0x27b   :  { %v2290_v61 = vpop.f32.mrf.mxu0 }
 0x27c   :  { %v918_v62 = vpack.c.bf16 %v778_v58, %v775_v57  ;;  %v799_v7 = vadd.f32 %v2290_v61, %v3057_v54 }
 0x27d   :  { %v790_v0 = vpop.f32.mrf.mxu0 }
 0x27e   :  { %2332 = vmatprep.mubr.bf16.mxu1 %v918_v62  ;;  %v791_v5 = vadd.f32 %v3057_v54, %v790_v0 }
 0x27f   :  { %v2291_v1 = vpop.f32.mrf.mxu0  ;;  %2333 = vmatmul.mubr.bf16.vlgmr.msra.gmra.mxu1 %v919_v63 }
 0x280   :  { %v802_v2 = vadd.f32 %v2291_v1, %v3057_v54 }
 0x281   :  { %v793_v4 = vpop.f32.mrf.mxu0 }
 0x282   :  { %v794_v6 = vadd.f32 %v3057_v54, %v793_v4  ;;  %v921_v10 = vpack.c.bf16 %v802_v2, %v799_v7  ;;  %v2515_v7 = vld [vmem:[%s3259_s9] sm:$0xff]  }
 0x283   :  { %v2294_v8 = vpop.f32.mrf.mxu0  ;;  %2378 = vmatprep.subr.bf16.mxu0 %v2515_v7 }
 0x284   :  { %v920_v9 = vpack.c.bf16 %v794_v6, %v791_v5  ;;  %v815_v17 = vadd.f32 %v2294_v8, %v3057_v54  ;;  %2379 = vmatpush3.bf16.msra.mxu0 %v2515_v7  ;;  %v2516_v8 = vld [vmem:[%s3261_s11 + $0x38] sm:$0xff]  }
 0x285   :  { %v806_v11 = vpop.f32.mrf.mxu0  ;;  %2460 = vmatprep.subr.bf16.mxu1 %v2516_v8  ;;  %2412 = vmatprep.subr.bf16.mxu0 %v2516_v8 }
 0x286   :  { %2336 = vmatprep.mubr.bf16.mxu1 %v920_v9  ;;  %v807_v15 = vadd.f32 %v3057_v54, %v806_v11  ;;  %v2517_v9 = vld [vmem:[%s3261_s11 + $0x30] sm:$0xff]   ;;  %2468 = vmatpush3.bf16.msra.mxu1 %v2516_v8  ;;  %v3112_v11 = vld [vmem:[%s3261_s11 + $0x18] sm:$0xff]  }
 0x287   :  { %v2295_v12 = vpop.f32.mrf.mxu0  ;;  %2337 = vmatmul.mubr.bf16.gmra.mxu1 %v921_v10  ;;  %2461 = vmatprep.subr.bf16.mxu1 %v2517_v9  ;;  %v3106_v10 = vld [vmem:[%s3261_s11 + $0x20] sm:$0xff]  }
 0x288   :  { %v818_v13 = vadd.f32 %v2295_v12, %v3057_v54  ;;  %v3119_v12 = vld [vmem:[%s3261_s11 + $0x10] sm:$0xff]  }
 0x289   :  { %v809_v14 = vpop.f32.mrf.mxu0 }
 0x28a   :  { %v810_v16 = vadd.f32 %v3057_v54, %v809_v14  ;;  %v923_v20 = vpack.c.bf16 %v818_v13, %v815_v17  ;;  %2469 = vmatpush3.bf16.msra.mxu1 %v2517_v9 }
 0x28b   :  { %v2298_v18 = vpop.f32.mrf.mxu0 }
 0x28c   :  { %v922_v19 = vpack.c.bf16 %v810_v16, %v807_v15  ;;  %v831_v27 = vadd.f32 %v2298_v18, %v3057_v54  ;;  %v3127_v15 = vld [vmem:[%s3258_s8] ss:$0 sm:$0xff] }
 0x28d   :  { %v822_v21 = vpop.f32.mrf.mxu0 }
 0x28e   :  { %2340 = vmatprep.mubr.bf16.mxu1 %v922_v19  ;;  %v823_v25 = vadd.f32 %v3057_v54, %v822_v21 }
 0x28f   :  { %v2299_v22 = vpop.f32.mrf.mxu0  ;;  %2341 = vmatmul.mubr.bf16.gmra.mxu1 %v923_v20 }
 0x290   :  { %v834_v23 = vadd.f32 %v2299_v22, %v3057_v54 }
 0x291   :  { %v825_v24 = vpop.f32.mrf.mxu0 }
 0x292   :  { %v826_v26 = vadd.f32 %v3057_v54, %v825_v24  ;;  %v925_v30 = vpack.c.bf16 %v834_v23, %v831_v27 }
 0x293   :  { %v2302_v28 = vpop.f32.mrf.mxu0 }
 0x294   :  { %v924_v29 = vpack.c.bf16 %v826_v26, %v823_v25  ;;  %v847_v37 = vadd.f32 %v2302_v28, %v3057_v54 }
 0x295   :  { %v838_v31 = vpop.f32.mrf.mxu0 }
 0x296   :  { %2344 = vmatprep.mubr.bf16.mxu1 %v924_v29  ;;  %v839_v35 = vadd.f32 %v3057_v54, %v838_v31 }
 0x297   :  { %v2303_v32 = vpop.f32.mrf.mxu0  ;;  %2345 = vmatmul.mubr.bf16.gmra.mxu1 %v925_v30 }
 0x298   :  { %v850_v33 = vadd.f32 %v2303_v32, %v3057_v54 }
 0x299   :  { %v841_v34 = vpop.f32.mrf.mxu0 }
 0x29a   :  { %v842_v36 = vadd.f32 %v3057_v54, %v841_v34  ;;  %v927_v40 = vpack.c.bf16 %v850_v33, %v847_v37 }
 0x29b   :  { %v2306_v38 = vpop.f32.mrf.mxu0 }
 0x29c   :  { %v926_v39 = vpack.c.bf16 %v842_v36, %v839_v35  ;;  %v863_v60 = vadd.f32 %v2306_v38, %v3057_v54 }
 0x29d   :  { %v854_v41 = vpop.f32.mrf.mxu0 }
 0x29e   :  { %2348 = vmatprep.mubr.bf16.mxu1 %v926_v39  ;;  %v855_v45 = vadd.f32 %v3057_v54, %v854_v41 }
 0x29f   :  { %v2307_v42 = vpop.f32.mrf.mxu0  ;;  %2349 = vmatmul.mubr.bf16.gmra.mxu1 %v927_v40 }
 0x2a0   :  { %v866_v43 = vadd.f32 %v2307_v42, %v3057_v54 }
 0x2a1   :  { %v857_v44 = vpop.f32.mrf.mxu0 }
 0x2a2   :  { %v858_v46 = vadd.f32 %v3057_v54, %v857_v44  ;;  %v929_v49 = vpack.c.bf16 %v866_v43, %v863_v60 }
 0x2a3   :  { %v2310_v47 = vpop.f32.mrf.mxu0 }
 0x2a4   :  { %v928_v48 = vpack.c.bf16 %v858_v46, %v855_v45  ;;  %v879_v56 = vadd.f32 %v2310_v47, %v3057_v54 }
 0x2a5   :  { %v870_v50 = vpop.f32.mrf.mxu0 }
 0x2a6   :  { %2352 = vmatprep.mubr.bf16.mxu1 %v928_v48  ;;  %v871_v53 = vadd.f32 %v3057_v54, %v870_v50 }
 0x2a7   :  { %v2311_v51 = vpop.f32.mrf.mxu0  ;;  %2353 = vmatmul.mubr.bf16.gmra.mxu1 %v929_v49 }
 0x2a8   :  { %v882_v52 = vadd.f32 %v2311_v51, %v3057_v54 }
 0x2a9   :  { %v873_v3 = vpop.f32.mrf.mxu0 }
 0x2aa   :  { %v874_v55 = vadd.f32 %v3057_v54, %v873_v3  ;;  %v931_v59 = vpack.c.bf16 %v882_v52, %v879_v56 }
 0x2ab   :  { %v2314_v57 = vpop.f32.mrf.mxu0 }
 0x2ac   :  { %v930_v58 = vpack.c.bf16 %v874_v55, %v871_v53  ;;  %v895_v4 = vadd.f32 %v2314_v57, %v3057_v54 }
 0x2ad   :  { %v886_v61 = vpop.f32.mrf.mxu0 }
 0x2ae   :  { %2356 = vmatprep.mubr.bf16.mxu1 %v930_v58  ;;  %v887_v1 = vadd.f32 %v3057_v54, %v886_v61 }
 0x2af   :  { %v2315_v62 = vpop.f32.mrf.mxu0  ;;  %2357 = vmatmul.mubr.bf16.gmra.mxu1 %v931_v59 }
 0x2b0   :  { %v898_v63 = vadd.f32 %v2315_v62, %v3057_v54 }
 0x2b1   :  { %v889_v0 = vpop.f32.mrf.mxu0 }
 0x2b2   :  { %v890_v2 = vadd.f32 %v3057_v54, %v889_v0  ;;  %v933_v6 = vpack.c.bf16 %v898_v63, %v895_v4  ;;  %v2518_v54 = vld [vmem:[%s3261_s11 + $0x28] sm:$0xff]  }
 0x2b3   :  { %2462 = vmatprep.subr.bf16.mxu1 %v2518_v54 }
 0x2b4   :  { %v932_v5 = vpack.c.bf16 %v890_v2, %v887_v1  ;;  %2470 = vmatpush3.bf16.msra.mxu1 %v2518_v54 }
 0x2b5   :  { %2463 = vmatprep.subr.bf16.mxu1 %v3106_v10 }
 0x2b6   :  { %2360 = vmatprep.mubr.bf16.mxu1 %v932_v5 }
 0x2b7   :  { %2361 = vmatmul.mubr.bf16.gmra.mxu1 %v933_v6 }
 0x2b8   :  { %2471 = vmatpush3.bf16.msra.mxu1 %v3106_v10 }
 0x2b9   :  { %2464 = vmatprep.subr.bf16.mxu1 %v3112_v11 }
 0x2bc   :  { %2472 = vmatpush3.bf16.msra.mxu1 %v3112_v11 }
 0x2bd   :  { %2465 = vmatprep.subr.bf16.mxu1 %v3119_v12 }
 0x2c0   :  { %2473 = vmatpush3.bf16.msra.mxu1 %v3119_v12 }
 0x33f   :  { %v2334_v13 = vpop.f32.mrf.mxu1 }
 0x340   :  { %v1031_v19 = vadd.f32 %v2334_v13, %v3127_v15 }
 0x341   :  { %v1022_v14 = vpop.f32.mrf.mxu1 }
 0x342   :  { %v1023_v17 = vadd.f32 %v3127_v15, %v1022_v14  ;;  %v1151_v26 = vmax.f32 %v1031_v19, 0.0 }
 0x343   :  { %v2335_v16 = vpop.f32.mrf.mxu1 }
 0x344   :  { %v1034_v18 = vadd.f32 %v2335_v16, %v3127_v15  ;;  %v1149_v24 = vmax.f32 %v1023_v17, 0.0 }
 0x345   :  { %v1025_v20 = vpop.f32.mrf.mxu1 }
 0x346   :  { %v1026_v21 = vadd.f32 %v3127_v15, %v1025_v20  ;;  %v1152_v22 = vmax.f32 %v1034_v18, 0.0 }
 0x347   :  { %v2338_v23 = vpop.f32.mrf.mxu1 }
 0x348   :  { %v1150_v25 = vmax.f32 %v1026_v21, 0.0  ;;  %v1199_v29 = vpack.c.bf16 %v1152_v22, %v1151_v26  ;;  %v1047_v33 = vadd.f32 %v2338_v23, %v3127_v15 }
 0x349   :  { %v1038_v27 = vpop.f32.mrf.mxu1 }
 0x34a   :  { %v1198_v28 = vpack.c.bf16 %v1150_v25, %v1149_v24  ;;  %v1039_v31 = vadd.f32 %v3127_v15, %v1038_v27  ;;  %v1155_v40 = vmax.f32 %v1047_v33, 0.0 }
 0x34b   :  { %v2339_v30 = vpop.f32.mrf.mxu1 }
 0x34c   :  { %v1050_v32 = vadd.f32 %v2339_v30, %v3127_v15  ;;  %2380 = vmatprep.mubr.bf16.mxu0 %v1198_v28  ;;  %v1153_v38 = vmax.f32 %v1039_v31, 0.0 }
 0x34d   :  { %v1041_v34 = vpop.f32.mrf.mxu1  ;;  %2381 = vmatmul.mubr.bf16.vlgmr.msra.gmra.mxu0 %v1199_v29 }
 0x34e   :  { %v1042_v35 = vadd.f32 %v3127_v15, %v1041_v34  ;;  %2413 = vmatpush3.bf16.msra.mxu0 %v2516_v8  ;;  %v1156_v36 = vmax.f32 %v1050_v32, 0.0 }
 0x34f   :  { %v2342_v37 = vpop.f32.mrf.mxu1  ;;  %2414 = vmatprep.subr.bf16.mxu0 %v2517_v9 }
 0x350   :  { %v1154_v39 = vmax.f32 %v1042_v35, 0.0  ;;  %v1201_v43 = vpack.c.bf16 %v1156_v36, %v1155_v40  ;;  %v1063_v60 = vadd.f32 %v2342_v37, %v3127_v15 }
 0x351   :  { %v1054_v41 = vpop.f32.mrf.mxu1 }
 0x352   :  { %v1200_v42 = vpack.c.bf16 %v1154_v39, %v1153_v38  ;;  %2415 = vmatpush3.bf16.msra.mxu0 %v2517_v9  ;;  %v1055_v45 = vadd.f32 %v3127_v15, %v1054_v41  ;;  %v1159_v3 = vmax.f32 %v1063_v60, 0.0 }
 0x353   :  { %v2343_v44 = vpop.f32.mrf.mxu1  ;;  %2416 = vmatprep.subr.bf16.mxu0 %v2518_v54 }
 0x354   :  { %v1066_v46 = vadd.f32 %v2343_v44, %v3127_v15  ;;  %2384 = vmatprep.mubr.bf16.mxu0 %v1200_v42  ;;  %v1157_v51 = vmax.f32 %v1055_v45, 0.0 }
 0x355   :  { %v1057_v47 = vpop.f32.mrf.mxu1  ;;  %2385 = vmatmul.mubr.bf16.gmra.mxu0 %v1201_v43 }
 0x356   :  { %v1058_v48 = vadd.f32 %v3127_v15, %v1057_v47  ;;  %2417 = vmatpush3.bf16.msra.mxu0 %v2518_v54  ;;  %v1160_v49 = vmax.f32 %v1066_v46, 0.0 }
 0x357   :  { %v2346_v50 = vpop.f32.mrf.mxu1  ;;  %2418 = vmatprep.subr.bf16.mxu0 %v3106_v10 }
 0x358   :  { %v1158_v52 = vmax.f32 %v1058_v48, 0.0  ;;  %v1203_v56 = vpack.c.bf16 %v1160_v49, %v1159_v3  ;;  %v1079_v61 = vadd.f32 %v2346_v50, %v3127_v15 }
 0x359   :  { %v1070_v53 = vpop.f32.mrf.mxu1 }
 0x35a   :  { %v1202_v55 = vpack.c.bf16 %v1158_v52, %v1157_v51  ;;  %2419 = vmatpush3.bf16.msra.mxu0 %v3106_v10  ;;  %v1071_v58 = vadd.f32 %v3127_v15, %v1070_v53  ;;  %v1163_v5 = vmax.f32 %v1079_v61, 0.0 }
 0x35b   :  { %v2347_v57 = vpop.f32.mrf.mxu1  ;;  %2420 = vmatprep.subr.bf16.mxu0 %v3112_v11 }
 0x35c   :  { %v1082_v59 = vadd.f32 %v2347_v57, %v3127_v15  ;;  %2388 = vmatprep.mubr.bf16.mxu0 %v1202_v55  ;;  %v1161_v2 = vmax.f32 %v1071_v58, 0.0 }
 0x35d   :  { %v1073_v62 = vpop.f32.mrf.mxu1  ;;  %2389 = vmatmul.mubr.bf16.gmra.mxu0 %v1203_v56 }
 0x35e   :  { %v1074_v63 = vadd.f32 %v3127_v15, %v1073_v62  ;;  %2421 = vmatpush3.bf16.msra.mxu0 %v3112_v11  ;;  %v1164_v0 = vmax.f32 %v1082_v59, 0.0 }
 0x35f   :  { %v2350_v1 = vpop.f32.mrf.mxu1  ;;  %2422 = vmatprep.subr.bf16.mxu0 %v3119_v12 }
 0x360   :  { %v1162_v4 = vmax.f32 %v1074_v63, 0.0  ;;  %v1205_v8 = vpack.c.bf16 %v1164_v0, %v1163_v5  ;;  %v1095_v11 = vadd.f32 %v2350_v1, %v3127_v15  ;;  %v2522_v63 = vld [vmem:[%s3261_s11 + $0x8] sm:$0xff]  }
 0x361   :  { %v1086_v6 = vpop.f32.mrf.mxu1  ;;  %2466 = vmatprep.subr.bf16.mxu1 %v2522_v63 }
 0x362   :  { %v1204_v7 = vpack.c.bf16 %v1162_v4, %v1161_v2  ;;  %2423 = vmatpush3.bf16.msra.mxu0 %v3119_v12  ;;  %v1087_v54 = vadd.f32 %v3127_v15, %v1086_v6  ;;  %v1167_v20 = vmax.f32 %v1095_v11, 0.0  ;;  %2474 = vmatpush3.bf16.msra.mxu1 %v2522_v63  ;;  %v3176_v2 = vld [vmem:[%s3260_s10] ss:$0 sm:$0xff] }
 0x363   :  { %v2351_v9 = vpop.f32.mrf.mxu1  ;;  %2424 = vmatprep.subr.bf16.mxu0 %v2522_v63 }
 0x364   :  { %v1098_v10 = vadd.f32 %v2351_v9, %v3127_v15  ;;  %2392 = vmatprep.mubr.bf16.mxu0 %v1204_v7  ;;  %v1165_v18 = vmax.f32 %v1087_v54, 0.0 }
 0x365   :  { %v1089_v13 = vpop.f32.mrf.mxu1  ;;  %2393 = vmatmul.mubr.bf16.gmra.mxu0 %v1205_v8 }
 0x366   :  { %v1090_v14 = vadd.f32 %v3127_v15, %v1089_v13  ;;  %v1168_v16 = vmax.f32 %v1098_v10, 0.0  ;;  %2425 = vmatpush3.bf16.msra.mxu0 %v2522_v63 }
 0x367   :  { %v2354_v17 = vpop.f32.mrf.mxu1 }
 0x368   :  { %v1166_v19 = vmax.f32 %v1090_v14, 0.0  ;;  %v1207_v22 = vpack.c.bf16 %v1168_v16, %v1167_v20  ;;  %v1111_v26 = vadd.f32 %v2354_v17, %v3127_v15 }
 0x369   :  { %v1102_v21 = vpop.f32.mrf.mxu1 }
 0x36a   :  { %v1206_v12 = vpack.c.bf16 %v1166_v19, %v1165_v18  ;;  %v1103_v24 = vadd.f32 %v3127_v15, %v1102_v21  ;;  %v1171_v33 = vmax.f32 %v1111_v26, 0.0 }
 0x36b   :  { %v2355_v23 = vpop.f32.mrf.mxu1 }
 0x36c   :  { %v1114_v25 = vadd.f32 %v2355_v23, %v3127_v15  ;;  %2396 = vmatprep.mubr.bf16.mxu0 %v1206_v12  ;;  %v1169_v31 = vmax.f32 %v1103_v24, 0.0 }
 0x36d   :  { %v1105_v27 = vpop.f32.mrf.mxu1  ;;  %2397 = vmatmul.mubr.bf16.gmra.mxu0 %v1207_v22 }
 0x36e   :  { %v1106_v28 = vadd.f32 %v3127_v15, %v1105_v27  ;;  %v1172_v29 = vmax.f32 %v1114_v25, 0.0 }
 0x36f   :  { %v2358_v30 = vpop.f32.mrf.mxu1 }
 0x370   :  { %v1170_v32 = vmax.f32 %v1106_v28, 0.0  ;;  %v1209_v36 = vpack.c.bf16 %v1172_v29, %v1171_v33  ;;  %v1127_v40 = vadd.f32 %v2358_v30, %v3127_v15 }
 0x371   :  { %v1118_v34 = vpop.f32.mrf.mxu1 }
 0x372   :  { %v1208_v35 = vpack.c.bf16 %v1170_v32, %v1169_v31  ;;  %v1119_v38 = vadd.f32 %v3127_v15, %v1118_v34  ;;  %v1175_v60 = vmax.f32 %v1127_v40, 0.0 }
 0x373   :  { %v2359_v37 = vpop.f32.mrf.mxu1 }
 0x374   :  { %v1130_v39 = vadd.f32 %v2359_v37, %v3127_v15  ;;  %2400 = vmatprep.mubr.bf16.mxu0 %v1208_v35  ;;  %v1173_v45 = vmax.f32 %v1119_v38, 0.0 }
 0x375   :  { %v1121_v41 = vpop.f32.mrf.mxu1  ;;  %2401 = vmatmul.mubr.bf16.gmra.mxu0 %v1209_v36 }
 0x376   :  { %v1122_v42 = vadd.f32 %v3127_v15, %v1121_v41  ;;  %v1176_v43 = vmax.f32 %v1130_v39, 0.0 }
 0x377   :  { %v2362_v44 = vpop.f32.mrf.mxu1 }
 0x378   :  { %v1174_v46 = vmax.f32 %v1122_v42, 0.0  ;;  %v1211_v49 = vpack.c.bf16 %v1176_v43, %v1175_v60  ;;  %v1143_v3 = vadd.f32 %v2362_v44, %v3127_v15 }
 0x379   :  { %v1134_v47 = vpop.f32.mrf.mxu1 }
 0x37a   :  { %v1210_v48 = vpack.c.bf16 %v1174_v46, %v1173_v45  ;;  %v1135_v51 = vadd.f32 %v3127_v15, %v1134_v47  ;;  %v1179_v59 = vmax.f32 %v1143_v3, 0.0 }
 0x37b   :  { %v2363_v50 = vpop.f32.mrf.mxu1 }
 0x37c   :  { %v1146_v52 = vadd.f32 %v2363_v50, %v3127_v15  ;;  %2404 = vmatprep.mubr.bf16.mxu0 %v1210_v48  ;;  %v1177_v57 = vmax.f32 %v1135_v51, 0.0 }
 0x37d   :  { %v1137_v53 = vpop.f32.mrf.mxu1  ;;  %2405 = vmatmul.mubr.bf16.gmra.mxu0 %v1211_v49 }
 0x37e   :  { %v1138_v55 = vadd.f32 %v3127_v15, %v1137_v53  ;;  %v1180_v56 = vmax.f32 %v1146_v52, 0.0  ;;  %v2523_v15 = vld [vmem:[%s3261_s11] sm:$0xff]  }
 0x37f   :  { %2426 = vmatprep.subr.bf16.mxu0 %v2523_v15  ;;  %2467 = vmatprep.subr.bf16.mxu1 %v2523_v15 }
 0x380   :  { %v1178_v58 = vmax.f32 %v1138_v55, 0.0  ;;  %v1213_v62 = vpack.c.bf16 %v1180_v56, %v1179_v59  ;;  %2427 = vmatpush3.bf16.msra.mxu0 %v2523_v15  ;;  %2475 = vmatpush3.bf16.msra.mxu1 %v2523_v15 }
 0x382   :  { %v1212_v61 = vpack.c.bf16 %v1178_v58, %v1177_v57 }
 0x384   :  { %2408 = vmatprep.mubr.bf16.mxu0 %v1212_v61 }
 0x385   :  { %2409 = vmatmul.mubr.bf16.gmra.mxu0 %v1213_v62 }
 0x40d   :  { %v2382_v0 = vpop.f32.mrf.mxu0 }
 0x40e   :  { %v1311_v7 = vadd.f32 %v2382_v0, %v3176_v2 }
 0x40f   :  { %v1302_v1 = vpop.f32.mrf.mxu0 }
 0x410   :  { %v1303_v5 = vadd.f32 %v3176_v2, %v1302_v1  ;;  %v1431_v14 = vmax.f32 %v1311_v7, 0.0 }
 0x411   :  { %v2383_v4 = vpop.f32.mrf.mxu0 }
 0x412   :  { %v1314_v6 = vadd.f32 %v2383_v4, %v3176_v2  ;;  %v1429_v11 = vmax.f32 %v1303_v5, 0.0 }
 0x413   :  { %v1305_v8 = vpop.f32.mrf.mxu0 }
 0x414   :  { %v1306_v9 = vadd.f32 %v3176_v2, %v1305_v8  ;;  %v1432_v54 = vmax.f32 %v1314_v6, 0.0 }
 0x415   :  { %v2386_v10 = vpop.f32.mrf.mxu0 }
 0x416   :  { %v1430_v13 = vmax.f32 %v1306_v9, 0.0  ;;  %v1479_v18 = vpack.c.bf16 %v1432_v54, %v1431_v14  ;;  %v1327_v12 = vadd.f32 %v2386_v10, %v3176_v2 }
 0x417   :  { %v1318_v16 = vpop.f32.mrf.mxu0 }
 0x418   :  { %v1478_v17 = vpack.c.bf16 %v1430_v13, %v1429_v11  ;;  %v1319_v20 = vadd.f32 %v3176_v2, %v1318_v16  ;;  %v1435_v28 = vmax.f32 %v1327_v12, 0.0 }
 0x419   :  { %v2387_v19 = vpop.f32.mrf.mxu0 }
 0x41a   :  { %v1330_v21 = vadd.f32 %v2387_v19, %v3176_v2  ;;  %2428 = vmatprep.mubr.bf16.mxu0 %v1478_v17  ;;  %v1433_v26 = vmax.f32 %v1319_v20, 0.0 }
 0x41b   :  { %v1321_v22 = vpop.f32.mrf.mxu0  ;;  %2429 = vmatmul.mubr.bf16.vlgmr.msra.gmra.mxu0 %v1479_v18 }
 0x41c   :  { %v1322_v23 = vadd.f32 %v3176_v2, %v1321_v22  ;;  %v1436_v24 = vmax.f32 %v1330_v21, 0.0 }
 0x41d   :  { %v2390_v25 = vpop.f32.mrf.mxu0 }
 0x41e   :  { %v1434_v27 = vmax.f32 %v1322_v23, 0.0  ;;  %v1481_v31 = vpack.c.bf16 %v1436_v24, %v1435_v28  ;;  %v1343_v35 = vadd.f32 %v2390_v25, %v3176_v2 }
 0x41f   :  { %v1334_v29 = vpop.f32.mrf.mxu0 }
 0x420   :  { %v1480_v30 = vpack.c.bf16 %v1434_v27, %v1433_v26  ;;  %v1335_v33 = vadd.f32 %v3176_v2, %v1334_v29  ;;  %v1439_v42 = vmax.f32 %v1343_v35, 0.0 }
 0x421   :  { %v2391_v32 = vpop.f32.mrf.mxu0 }
 0x422   :  { %v1346_v34 = vadd.f32 %v2391_v32, %v3176_v2  ;;  %2432 = vmatprep.mubr.bf16.mxu1 %v1480_v30  ;;  %v1437_v40 = vmax.f32 %v1335_v33, 0.0 }
 0x423   :  { %v1337_v36 = vpop.f32.mrf.mxu0  ;;  %2433 = vmatmul.mubr.bf16.vlgmr.msra.gmra.mxu1 %v1481_v31 }
 0x424   :  { %v1338_v37 = vadd.f32 %v3176_v2, %v1337_v36  ;;  %v1440_v38 = vmax.f32 %v1346_v34, 0.0 }
 0x425   :  { %v2394_v39 = vpop.f32.mrf.mxu0 }
 0x426   :  { %v1438_v41 = vmax.f32 %v1338_v37, 0.0  ;;  %v1483_v45 = vpack.c.bf16 %v1440_v38, %v1439_v42  ;;  %v1359_v48 = vadd.f32 %v2394_v39, %v3176_v2 }
 0x427   :  { %v1350_v43 = vpop.f32.mrf.mxu0 }
 0x428   :  { %v1482_v44 = vpack.c.bf16 %v1438_v41, %v1437_v40  ;;  %v1351_v60 = vadd.f32 %v3176_v2, %v1350_v43  ;;  %v1443_v55 = vmax.f32 %v1359_v48, 0.0 }
 0x429   :  { %v2395_v46 = vpop.f32.mrf.mxu0 }
 0x42a   :  { %v1362_v47 = vadd.f32 %v2395_v46, %v3176_v2  ;;  %2436 = vmatprep.mubr.bf16.mxu1 %v1482_v44  ;;  %v1441_v3 = vmax.f32 %v1351_v60, 0.0 }
 0x42b   :  { %v1353_v49 = vpop.f32.mrf.mxu0  ;;  %2437 = vmatmul.mubr.bf16.gmra.mxu1 %v1483_v45 }
 0x42c   :  { %v1354_v50 = vadd.f32 %v3176_v2, %v1353_v49  ;;  %v1444_v51 = vmax.f32 %v1362_v47, 0.0 }
 0x42d   :  { %v2398_v52 = vpop.f32.mrf.mxu0 }
 0x42e   :  { %v1442_v53 = vmax.f32 %v1354_v50, 0.0  ;;  %v1485_v58 = vpack.c.bf16 %v1444_v51, %v1443_v55  ;;  %v1375_v63 = vadd.f32 %v2398_v52, %v3176_v2  ;;  %v3213_v50 = vld [vmem:[%s3262_s12] ss:$0 sm:$0xff]  ;;  %s2699_s12 = smov [#allocation5]  }
 0x42f   :  { %v1366_v56 = vpop.f32.mrf.mxu0  ;;  %s1938_s23 = sshll.u32 %s2699_s12, 4  ;;  %s1939_s23 = int_to_ptr.vmem [resolvable:$true] %s1938_s23 }
 0x430   :  { %v1484_v57 = vpack.c.bf16 %v1442_v53, %v1441_v3  ;;  %v1367_v61 = vadd.f32 %v3176_v2, %v1366_v56  ;;  %v1447_v7 = vmax.f32 %v1375_v63, 0.0  ;;  %s2672_s5 = scalar_lea.vmem %s1939_s23, 4096  ;;  %p2677_p6 = scmp.lt.s32.totalorder %s1939_s23, %s1939_s23 }
 0x431   :  { %v2399_v59 = vpop.f32.mrf.mxu0  ;;  %p2673_p5 = scmp.ne.s32.totalorder %s1939_s23, %s2672_s5  ;;  %p2678_p7 = scmp.lt.s32.totalorder %s2672_s5, %s2672_s5 }
 0x432   :  { %v1378_v62 = vadd.f32 %v2399_v59, %v3176_v2  ;;  %2440 = vmatprep.mubr.bf16.mxu1 %v1484_v57  ;;  %v1445_v5 = vmax.f32 %v1367_v61, 0.0 }
 0x433   :  { %v1369_v15 = vpop.f32.mrf.mxu0  ;;  %2441 = vmatmul.mubr.bf16.gmra.mxu1 %v1485_v58  ;;  %p2679_p8 = por %p2678_p7, %p2677_p6 }
 0x434   :  { %v1370_v0 = vadd.f32 %v3176_v2, %v1369_v15  ;;  %v1448_v1 = vmax.f32 %v1378_v62, 0.0 }
 0x435   :  { %v2402_v4 = vpop.f32.mrf.mxu0  ;;  %p2680_p9 = pnand %p2679_p8, %p2673_p5 }
 0x436   :  { %v1446_v6 = vmax.f32 %v1370_v0, 0.0  ;;  %v1487_v54 = vpack.c.bf16 %v1448_v1, %v1447_v7  ;;  %v1391_v14 = vadd.f32 %v2402_v4, %v3176_v2 }
 0x437   :  { %v1382_v8 = vpop.f32.mrf.mxu0 }
 0x438   :  { %v1486_v9 = vpack.c.bf16 %v1446_v6, %v1445_v5  ;;  %v1383_v11 = vadd.f32 %v3176_v2, %v1382_v8  ;;  %v1451_v12 = vmax.f32 %v1391_v14, 0.0 }
 0x439   :  { %v2403_v10 = vpop.f32.mrf.mxu0 }
 0x43a   :  { %v1394_v13 = vadd.f32 %v2403_v10, %v3176_v2  ;;  %2444 = vmatprep.mubr.bf16.mxu1 %v1486_v9  ;;  %v1449_v20 = vmax.f32 %v1383_v11, 0.0 }
 0x43b   :  { %v1385_v16 = vpop.f32.mrf.mxu0  ;;  %2445 = vmatmul.mubr.bf16.gmra.mxu1 %v1487_v54 }
 0x43c   :  { %v1386_v17 = vadd.f32 %v3176_v2, %v1385_v16  ;;  %v1452_v18 = vmax.f32 %v1394_v13, 0.0 }
 0x43d   :  { %v2406_v19 = vpop.f32.mrf.mxu0 }
 0x43e   :  { %v1450_v21 = vmax.f32 %v1386_v17, 0.0  ;;  %v1489_v24 = vpack.c.bf16 %v1452_v18, %v1451_v12  ;;  %v1407_v28 = vadd.f32 %v2406_v19, %v3176_v2 }
 0x43f   :  { %v1398_v22 = vpop.f32.mrf.mxu0 }
 0x440   :  { %v1488_v23 = vpack.c.bf16 %v1450_v21, %v1449_v20  ;;  %v1399_v26 = vadd.f32 %v3176_v2, %v1398_v22  ;;  %v1455_v35 = vmax.f32 %v1407_v28, 0.0 }
 0x441   :  { %v2407_v25 = vpop.f32.mrf.mxu0 }
 0x442   :  { %v1410_v27 = vadd.f32 %v2407_v25, %v3176_v2  ;;  %2448 = vmatprep.mubr.bf16.mxu1 %v1488_v23  ;;  %v1453_v33 = vmax.f32 %v1399_v26, 0.0 }
 0x443   :  { %v1401_v29 = vpop.f32.mrf.mxu0  ;;  %2449 = vmatmul.mubr.bf16.gmra.mxu1 %v1489_v24 }
 0x444   :  { %v1402_v30 = vadd.f32 %v3176_v2, %v1401_v29  ;;  %v1456_v31 = vmax.f32 %v1410_v27, 0.0 }
 0x445   :  { %v2410_v32 = vpop.f32.mrf.mxu0 }
 0x446   :  { %v1454_v34 = vmax.f32 %v1402_v30, 0.0  ;;  %v1491_v38 = vpack.c.bf16 %v1456_v31, %v1455_v35  ;;  %v1423_v42 = vadd.f32 %v2410_v32, %v3176_v2 }
 0x447   :  { %v1414_v36 = vpop.f32.mrf.mxu0 }
 0x448   :  { %v1490_v37 = vpack.c.bf16 %v1454_v34, %v1453_v33  ;;  %v1415_v40 = vadd.f32 %v3176_v2, %v1414_v36  ;;  %v1459_v47 = vmax.f32 %v1423_v42, 0.0 }
 0x449   :  { %v2411_v39 = vpop.f32.mrf.mxu0 }
 0x44a   :  { %v1426_v41 = vadd.f32 %v2411_v39, %v3176_v2  ;;  %2452 = vmatprep.mubr.bf16.mxu1 %v1490_v37  ;;  %v1457_v46 = vmax.f32 %v1415_v40, 0.0 }
 0x44b   :  { %v1417_v43 = vpop.f32.mrf.mxu0  ;;  %2453 = vmatmul.mubr.bf16.gmra.mxu1 %v1491_v38 }
 0x44c   :  { %v1418_v44 = vadd.f32 %v3176_v2, %v1417_v43  ;;  %v1460_v45 = vmax.f32 %v1426_v41, 0.0 }
 0x44e   :  { %v1458_v60 = vmax.f32 %v1418_v44, 0.0  ;;  %v1493_v49 = vpack.c.bf16 %v1460_v45, %v1459_v47 }
 0x450   :  { %v1492_v48 = vpack.c.bf16 %v1458_v60, %v1457_v46 }
 0x452   :  { %2456 = vmatprep.mubr.bf16.mxu1 %v1492_v48 }
 0x453   :  { %2457 = vmatmul.mubr.bf16.gmra.mxu1 %v1493_v49 }
 0x4db   :  { %v2430_v51 = vpop.f32.mrf.mxu0 }
 0x4dc   :  { %v1591_v52 = vadd.f32 %v2430_v51, %v3213_v50 }
 0x4dd   :  { %v1582_v3 = vpop.f32.mrf.mxu0 }
 0x4de   :  { %v2016_v53 = vmul.f32 -1.442695, %v1591_v52  ;;  %v1583_v2 = vadd.f32 %v3213_v50, %v1582_v3 }
 0x4df   :  { %v2431_v55 = vpop.f32.mrf.mxu0 }
 0x4e0   :  { %2524 = vpow2.f32 %v2016_v53  ;;  %v2014_v56 = vmul.f32 -1.442695, %v1583_v2  ;;  %v1594_v57 = vadd.f32 %v2431_v55, %v3213_v50 }
 0x4e1   :  { %v1585_v58 = vpop.f32.mrf.mxu0 }
 0x4e2   :  { %2526 = vpow2.f32 %v2014_v56  ;;  %v2017_v59 = vmul.f32 -1.442695, %v1594_v57  ;;  %v1586_v61 = vadd.f32 %v3213_v50, %v1585_v58 }
 0x4e3   :  { %v2434_v62 = vpop.f32.mrf.mxu1 }
 0x4e4   :  { %2528 = vpow2.f32 %v2017_v59  ;;  %v2015_v63 = vmul.f32 -1.442695, %v1586_v61  ;;  %v1607_v15 = vadd.f32 %v2434_v62, %v3213_v50 }
 0x4e5   :  { %v1598_v0 = vpop.f32.mrf.mxu1 }
 0x4e6   :  { %2530 = vpow2.f32 %v2015_v63  ;;  %v2020_v1 = vmul.f32 -1.442695, %v1607_v15  ;;  %v1599_v4 = vadd.f32 %v3213_v50, %v1598_v0 }
 0x4e7   :  { %v2435_v5 = vpop.f32.mrf.mxu1 }
 0x4e8   :  { %2532 = vpow2.f32 %v2020_v1  ;;  %v2018_v6 = vmul.f32 -1.442695, %v1599_v4  ;;  %v1610_v7 = vadd.f32 %v2435_v5, %v3213_v50 }
 0x4e9   :  { %v1601_v8 = vpop.f32.mrf.mxu1 }
 0x4ea   :  { %2534 = vpow2.f32 %v2018_v6  ;;  %v2021_v9 = vmul.f32 -1.442695, %v1610_v7  ;;  %v1602_v54 = vadd.f32 %v3213_v50, %v1601_v8 }
 0x4eb   :  { %v2438_v10 = vpop.f32.mrf.mxu1 }
 0x4ec   :  { %2536 = vpow2.f32 %v2021_v9  ;;  %v2019_v11 = vmul.f32 -1.442695, %v1602_v54  ;;  %v1623_v13 = vadd.f32 %v2438_v10, %v3213_v50 }
 0x4ed   :  { %v2525_v14 = vpop.eup %2524  ;;  %v1614_v16 = vpop.f32.mrf.mxu1 }
 0x4ee   :  { %v1807_v17 = vadd.f32 1.0, %v2525_v14  ;;  %2538 = vpow2.f32 %v2019_v11  ;;  %v2024_v18 = vmul.f32 -1.442695, %v1623_v13  ;;  %v1615_v19 = vadd.f32 %v3213_v50, %v1614_v16 }
 0x4ef   :  { %v2527_v20 = vpop.eup %2526  ;;  %v2439_v21 = vpop.f32.mrf.mxu1 }
 0x4f0   :  { %2540 = vrcp.f32 %v1807_v17  ;;  %v1805_v12 = vadd.f32 1.0, %v2527_v20  ;;  %v2022_v22 = vmul.f32 -1.442695, %v1615_v19  ;;  %v1626_v23 = vadd.f32 %v2439_v21, %v3213_v50 }
 0x4f1   :  { %v2529_v24 = vpop.eup %2528  ;;  %2542 = vpow2.f32 %v2024_v18  ;;  %v1617_v25 = vpop.f32.mrf.mxu1 }
 0x4f2   :  { %2544 = vrcp.f32 %v1805_v12  ;;  %v1808_v26 = vadd.f32 1.0, %v2529_v24  ;;  %v2025_v27 = vmul.f32 -1.442695, %v1626_v23  ;;  %v1618_v28 = vadd.f32 %v3213_v50, %v1617_v25 }
 0x4f3   :  { %v2531_v29 = vpop.eup %2530  ;;  %2546 = vpow2.f32 %v2022_v22  ;;  %v2442_v30 = vpop.f32.mrf.mxu1 }
 0x4f4   :  { %2548 = vrcp.f32 %v1808_v26  ;;  %v1806_v31 = vadd.f32 1.0, %v2531_v29  ;;  %v2023_v32 = vmul.f32 -1.442695, %v1618_v28  ;;  %v1639_v33 = vadd.f32 %v2442_v30, %v3213_v50 }
 0x4f5   :  { %v2533_v34 = vpop.eup %2532  ;;  %2550 = vpow2.f32 %v2025_v27  ;;  %v1630_v35 = vpop.f32.mrf.mxu1 }
 0x4f6   :  { %2552 = vrcp.f32 %v1806_v31  ;;  %v1811_v36 = vadd.f32 1.0, %v2533_v34  ;;  %v2028_v37 = vmul.f32 -1.442695, %v1639_v33  ;;  %v1631_v38 = vadd.f32 %v3213_v50, %v1630_v35 }
 0x4f7   :  { %v2535_v39 = vpop.eup %2534  ;;  %2554 = vpow2.f32 %v2023_v32  ;;  %v2443_v40 = vpop.f32.mrf.mxu1 }
 0x4f8   :  { %2556 = vrcp.f32 %v1811_v36  ;;  %v1809_v41 = vadd.f32 1.0, %v2535_v39  ;;  %v2026_v42 = vmul.f32 -1.442695, %v1631_v38  ;;  %v1642_v43 = vadd.f32 %v2443_v40, %v3213_v50 }
 0x4f9   :  { %v2537_v44 = vpop.eup %2536  ;;  %2558 = vpow2.f32 %v2028_v37  ;;  %v1633_v45 = vpop.f32.mrf.mxu1 }
 0x4fa   :  { %2560 = vrcp.f32 %v1809_v41  ;;  %v1812_v46 = vadd.f32 1.0, %v2537_v44  ;;  %v2029_v60 = vmul.f32 -1.442695, %v1642_v43  ;;  %v1634_v47 = vadd.f32 %v3213_v50, %v1633_v45 }
 0x4fb   :  { %v2539_v48 = vpop.eup %2538  ;;  %2562 = vpow2.f32 %v2026_v42  ;;  %v2446_v49 = vpop.f32.mrf.mxu1 }
 0x4fc   :  { %2564 = vrcp.f32 %v1812_v46  ;;  %v1810_v51 = vadd.f32 1.0, %v2539_v48  ;;  %v2027_v52 = vmul.f32 -1.442695, %v1634_v47  ;;  %v1655_v3 = vadd.f32 %v2446_v49, %v3213_v50 }
 0x4fd   :  { %v2541_v53 = vpop.eup %2540  ;;  %2566 = vpow2.f32 %v2029_v60  ;;  %v1646_v2 = vpop.f32.mrf.mxu1 }
 0x4fe   :  { %v2543_v55 = vpop.eup %2542  ;;  %1903 = vst [vmem:[#allocation5 + $0x10] sm:$0xff] %v2541_v53  ;;  %2568 = vrcp.f32 %v1810_v51  ;;  %v2032_v56 = vmul.f32 -1.442695, %v1655_v3  ;;  %v1647_v57 = vadd.f32 %v3213_v50, %v1646_v2 }
 0x4ff   :  { %v2545_v58 = vpop.eup %2544  ;;  %v1815_v59 = vadd.f32 1.0, %v2543_v55  ;;  %2570 = vpow2.f32 %v2027_v52  ;;  %v2447_v61 = vpop.f32.mrf.mxu1 }
 0x500   :  { %v2547_v62 = vpop.eup %2546  ;;  %1901 = vst [vmem:[#allocation5] sm:$0xff] %v2545_v58  ;;  %2572 = vpow2.f32 %v2032_v56  ;;  %v2030_v63 = vmul.f32 -1.442695, %v1647_v57  ;;  %v1658_v15 = vadd.f32 %v2447_v61, %v3213_v50 }
 0x501   :  { %v2549_v0 = vpop.eup %2548  ;;  %2574 = vrcp.f32 %v1815_v59  ;;  %v1813_v1 = vadd.f32 1.0, %v2547_v62  ;;  %v1649_v4 = vpop.f32.mrf.mxu1 }
 0x502   :  { %v2551_v5 = vpop.eup %2550  ;;  %1904 = vst [vmem:[#allocation5 + $0x18] sm:$0xff] %v2549_v0  ;;  %2576 = vpow2.f32 %v2030_v63  ;;  %v2033_v6 = vmul.f32 -1.442695, %v1658_v15  ;;  %v1650_v7 = vadd.f32 %v3213_v50, %v1649_v4 }
 0x503   :  { %v2553_v8 = vpop.eup %2552  ;;  %2578 = vrcp.f32 %v1813_v1  ;;  %v1816_v9 = vadd.f32 1.0, %v2551_v5  ;;  %v2450_v54 = vpop.f32.mrf.mxu1 }
 0x504   :  { %v2555_v10 = vpop.eup %2554  ;;  %1902 = vst [vmem:[#allocation5 + $0x8] sm:$0xff] %v2553_v8  ;;  %2580 = vpow2.f32 %v2033_v6  ;;  %v2031_v11 = vmul.f32 -1.442695, %v1650_v7  ;;  %v1671_v13 = vadd.f32 %v2450_v54, %v3213_v50 }
 0x505   :  { %v2557_v14 = vpop.eup %2556  ;;  %2582 = vrcp.f32 %v1816_v9  ;;  %v1814_v16 = vadd.f32 1.0, %v2555_v10  ;;  %v1662_v17 = vpop.f32.mrf.mxu1 }
 0x506   :  { %v2559_v18 = vpop.eup %2558  ;;  %1907 = vst [vmem:[#allocation5 + $0x30] sm:$0xff] %v2557_v14  ;;  %2584 = vpow2.f32 %v2031_v11  ;;  %v2036_v19 = vmul.f32 -1.442695, %v1671_v13  ;;  %v1663_v20 = vadd.f32 %v3213_v50, %v1662_v17 }
 0x507   :  { %v2561_v21 = vpop.eup %2560  ;;  %2586 = vrcp.f32 %v1814_v16  ;;  %v1819_v12 = vadd.f32 1.0, %v2559_v18  ;;  %v2451_v22 = vpop.f32.mrf.mxu1 }
 0x508   :  { %v2563_v23 = vpop.eup %2562  ;;  %1905 = vst [vmem:[#allocation5 + $0x20] sm:$0xff] %v2561_v21  ;;  %2588 = vpow2.f32 %v2036_v19  ;;  %v2034_v24 = vmul.f32 -1.442695, %v1663_v20  ;;  %v1674_v25 = vadd.f32 %v2451_v22, %v3213_v50 }
 0x509   :  { %v2565_v26 = vpop.eup %2564  ;;  %2590 = vrcp.f32 %v1819_v12  ;;  %v1817_v27 = vadd.f32 1.0, %v2563_v23  ;;  %v1665_v28 = vpop.f32.mrf.mxu1 }
 0x50a   :  { %v2567_v29 = vpop.eup %2566  ;;  %1908 = vst [vmem:[#allocation5 + $0x38] sm:$0xff] %v2565_v26  ;;  %2592 = vpow2.f32 %v2034_v24  ;;  %v2037_v30 = vmul.f32 -1.442695, %v1674_v25  ;;  %v1666_v31 = vadd.f32 %v3213_v50, %v1665_v28 }
 0x50b   :  { %v2569_v32 = vpop.eup %2568  ;;  %2594 = vrcp.f32 %v1817_v27  ;;  %v1820_v33 = vadd.f32 1.0, %v2567_v29  ;;  %v2454_v34 = vpop.f32.mrf.mxu1 }
 0x50c   :  { %v2571_v35 = vpop.eup %2570  ;;  %1906 = vst [vmem:[#allocation5 + $0x28] sm:$0xff] %v2569_v32  ;;  %2596 = vpow2.f32 %v2037_v30  ;;  %v2035_v36 = vmul.f32 -1.442695, %v1666_v31  ;;  %v1687_v37 = vadd.f32 %v2454_v34, %v3213_v50 }
 0x50d   :  { %v2573_v38 = vpop.eup %2572  ;;  %2598 = vrcp.f32 %v1820_v33  ;;  %v1818_v39 = vadd.f32 1.0, %v2571_v35  ;;  %v1678_v40 = vpop.f32.mrf.mxu1 }
 0x50e   :  { %v2575_v41 = vpop.eup %2574  ;;  %v1823_v42 = vadd.f32 1.0, %v2573_v38  ;;  %2600 = vpow2.f32 %v2035_v36  ;;  %v2040_v43 = vmul.f32 -1.442695, %v1687_v37  ;;  %v1679_v44 = vadd.f32 %v3213_v50, %v1678_v40 }
 0x50f   :  { %v2577_v45 = vpop.eup %2576  ;;  %1911 = vst [vmem:[#allocation5 + $0x50] sm:$0xff] %v2575_v41  ;;  %2602 = vrcp.f32 %v1818_v39  ;;  %v2455_v46 = vpop.f32.mrf.mxu1 }
 0x510   :  { %v2579_v60 = vpop.eup %2578  ;;  %2604 = vrcp.f32 %v1823_v42  ;;  %v1821_v47 = vadd.f32 1.0, %v2577_v45  ;;  %v2038_v48 = vmul.f32 -1.442695, %v1679_v44  ;;  %v1690_v49 = vadd.f32 %v2455_v46, %v3213_v50 }
 0x511   :  { %v2581_v51 = vpop.eup %2580  ;;  %1909 = vst [vmem:[#allocation5 + $0x40] sm:$0xff] %v2579_v60  ;;  %2606 = vpow2.f32 %v2040_v43  ;;  %v1681_v52 = vpop.f32.mrf.mxu1 }
 0x512   :  { %v2583_v3 = vpop.eup %2582  ;;  %2608 = vrcp.f32 %v1821_v47  ;;  %v1824_v53 = vadd.f32 1.0, %v2581_v51  ;;  %v2041_v2 = vmul.f32 -1.442695, %v1690_v49  ;;  %v1682_v55 = vadd.f32 %v3213_v50, %v1681_v52 }
 0x513   :  { %v2585_v56 = vpop.eup %2584  ;;  %1912 = vst [vmem:[#allocation5 + $0x58] sm:$0xff] %v2583_v3  ;;  %2610 = vpow2.f32 %v2038_v48  ;;  %v2458_v57 = vpop.f32.mrf.mxu1 }
 0x514   :  { %v2587_v58 = vpop.eup %2586  ;;  %2612 = vrcp.f32 %v1824_v53  ;;  %v1822_v59 = vadd.f32 1.0, %v2585_v56  ;;  %v2039_v61 = vmul.f32 -1.442695, %v1682_v55  ;;  %v1703_v62 = vadd.f32 %v2458_v57, %v3213_v50 }
 0x515   :  { %v2589_v63 = vpop.eup %2588  ;;  %1910 = vst [vmem:[#allocation5 + $0x48] sm:$0xff] %v2587_v58  ;;  %2614 = vpow2.f32 %v2041_v2  ;;  %v1694_v15 = vpop.f32.mrf.mxu1 }
 0x516   :  { %v2591_v0 = vpop.eup %2590  ;;  %2616 = vrcp.f32 %v1822_v59  ;;  %v1827_v1 = vadd.f32 1.0, %v2589_v63  ;;  %v2044_v4 = vmul.f32 -1.442695, %v1703_v62  ;;  %v1695_v5 = vadd.f32 %v3213_v50, %v1694_v15 }
 0x517   :  { %v2593_v6 = vpop.eup %2592  ;;  %1915 = vst [vmem:[#allocation5 + $0x70] sm:$0xff] %v2591_v0  ;;  %2618 = vpow2.f32 %v2039_v61  ;;  %v2459_v7 = vpop.f32.mrf.mxu1 }
 0x518   :  { %v2595_v8 = vpop.eup %2594  ;;  %2620 = vrcp.f32 %v1827_v1  ;;  %v1825_v9 = vadd.f32 1.0, %v2593_v6  ;;  %v2042_v54 = vmul.f32 -1.442695, %v1695_v5  ;;  %v1706_v10 = vadd.f32 %v2459_v7, %v3213_v50 }
 0x519   :  { %v2597_v11 = vpop.eup %2596  ;;  %1913 = vst [vmem:[#allocation5 + $0x60] sm:$0xff] %v2595_v8  ;;  %2622 = vpow2.f32 %v2044_v4  ;;  %v1697_v13 = vpop.f32.mrf.mxu1 }
 0x51a   :  { %v2599_v14 = vpop.eup %2598  ;;  %2624 = vrcp.f32 %v1825_v9  ;;  %v1828_v16 = vadd.f32 1.0, %v2597_v11  ;;  %v2045_v17 = vmul.f32 -1.442695, %v1706_v10  ;;  %v1698_v18 = vadd.f32 %v3213_v50, %v1697_v13 }
 0x51b   :  { %v2601_v19 = vpop.eup %2600  ;;  %1916 = vst [vmem:[#allocation5 + $0x78] sm:$0xff] %v2599_v14  ;;  %2626 = vpow2.f32 %v2042_v54 }
 0x51c   :  { %v2603_v20 = vpop.eup %2602  ;;  %2628 = vrcp.f32 %v1828_v16  ;;  %v1826_v21 = vadd.f32 1.0, %v2601_v19  ;;  %v2043_v12 = vmul.f32 -1.442695, %v1698_v18 }
 0x51d   :  { %v2605_v22 = vpop.eup %2604  ;;  %1914 = vst [vmem:[#allocation5 + $0x68] sm:$0xff] %v2603_v20  ;;  %2630 = vpow2.f32 %v2045_v17 }
 0x51e   :  { %v2607_v23 = vpop.eup %2606  ;;  %1919 = vst [vmem:[#allocation5 + $0x90] sm:$0xff] %v2605_v22  ;;  %2632 = vrcp.f32 %v1826_v21 }
 0x51f   :  { %v2609_v24 = vpop.eup %2608  ;;  %v1831_v25 = vadd.f32 1.0, %v2607_v23  ;;  %2634 = vpow2.f32 %v2043_v12 }
 0x520   :  { %v2611_v26 = vpop.eup %2610  ;;  %1917 = vst [vmem:[#allocation5 + $0x80] sm:$0xff] %v2609_v24 }
 0x521   :  { %v2613_v27 = vpop.eup %2612  ;;  %2636 = vrcp.f32 %v1831_v25  ;;  %v1829_v50 = vadd.f32 1.0, %v2611_v26 }
 0x522   :  { %v2615_v28 = vpop.eup %2614  ;;  %1920 = vst [vmem:[#allocation5 + $0x98] sm:$0xff] %v2613_v27 }
 0x523   :  { %v2617_v29 = vpop.eup %2616  ;;  %2638 = vrcp.f32 %v1829_v50  ;;  %v1832_v30 = vadd.f32 1.0, %v2615_v28 }
 0x524   :  { %v2619_v31 = vpop.eup %2618  ;;  %1918 = vst [vmem:[#allocation5 + $0x88] sm:$0xff] %v2617_v29 }
 0x525   :  { %v2621_v32 = vpop.eup %2620  ;;  %2640 = vrcp.f32 %v1832_v30  ;;  %v1830_v33 = vadd.f32 1.0, %v2619_v31 }
 0x526   :  { %v2623_v34 = vpop.eup %2622  ;;  %1923 = vst [vmem:[#allocation5 + $0xb0] sm:$0xff] %v2621_v32 }
 0x527   :  { %v2625_v35 = vpop.eup %2624  ;;  %2642 = vrcp.f32 %v1830_v33  ;;  %v1835_v36 = vadd.f32 1.0, %v2623_v34 }
 0x528   :  { %v2627_v37 = vpop.eup %2626  ;;  %1921 = vst [vmem:[#allocation5 + $0xa0] sm:$0xff] %v2625_v35 }
 0x529   :  { %v2629_v38 = vpop.eup %2628  ;;  %2644 = vrcp.f32 %v1835_v36  ;;  %v1833_v39 = vadd.f32 1.0, %v2627_v37 }
 0x52a   :  { %v2631_v40 = vpop.eup %2630  ;;  %1924 = vst [vmem:[#allocation5 + $0xb8] sm:$0xff] %v2629_v38 }
 0x52b   :  { %v2633_v41 = vpop.eup %2632  ;;  %2646 = vrcp.f32 %v1833_v39  ;;  %v1836_v42 = vadd.f32 1.0, %v2631_v40 }
 0x52c   :  { %v2635_v43 = vpop.eup %2634  ;;  %1922 = vst [vmem:[#allocation5 + $0xa8] sm:$0xff] %v2633_v41 }
 0x52d   :  { %2648 = vrcp.f32 %v1836_v42  ;;  %v1834_v44 = vadd.f32 1.0, %v2635_v43 }
 0x52e   :  { %v2637_v45 = vpop.eup %2636 }
 0x52f   :  { %1927 = vst [vmem:[#allocation5 + $0xd0] sm:$0xff] %v2637_v45  ;;  %2650 = vrcp.f32 %v1834_v44 }
 0x530   :  { %v2639_v46 = vpop.eup %2638 }
 0x531   :  { %1925 = vst [vmem:[#allocation5 + $0xc0] sm:$0xff] %v2639_v46 }
 0x532   :  { %v2641_v60 = vpop.eup %2640 }
 0x533   :  { %1928 = vst [vmem:[#allocation5 + $0xd8] sm:$0xff] %v2641_v60 }
 0x534   :  { %v2643_v47 = vpop.eup %2642 }
 0x535   :  { %1926 = vst [vmem:[#allocation5 + $0xc8] sm:$0xff] %v2643_v47 }
 0x536   :  { %v2645_v48 = vpop.eup %2644 }
 0x537   :  { %1931 = vst [vmem:[#allocation5 + $0xf0] sm:$0xff] %v2645_v48 }
 0x538   :  { %v2647_v49 = vpop.eup %2646 }
 0x539   :  { %1929 = vst [vmem:[#allocation5 + $0xe0] sm:$0xff] %v2647_v49 }
 0x53a   :  { %v2649_v51 = vpop.eup %2648 }
 0x53b   :  { %1932 = vst [vmem:[#allocation5 + $0xf8] sm:$0xff] %v2649_v51 }
 0x53c   :  { %v2651_v52 = vpop.eup %2650 }
 0x53d   :  { %1930 = vst [vmem:[#allocation5 + $0xe8] sm:$0xff] %v2651_v52 }
 0x53e   :  { %2683 = shalt.err (!%p2680_p9)
}
 0x53f   :  { %s2700_s24 = smov 128   ;;  %s2701_s25 = smov 8  }
 0x540   :  { %1944 = dma.vmem_to_hbm [thread:$0]  %s1939_s23, 4096, %s3263_s13, [#allocation4], %s2700_s24, %s2700_s24, %s2701_s25  }
 0x541   :  { %2694 = dma.done.wait [#allocation4], 4096  }
 0x542   :  { %2695 = vsyncadd [#allocation4], 4294963200 }
 0x543   :  { %1948 = vsyncpa [#allocation3], 1 }
 0x544   :  { %1949 = vsyncpa [#allocation4], 1 }

</bundles_post_ra>
